<compile_context>
chip_gen: v6e
topology: v6e:2x2x1
jax: 0.10.0
libtpu: 0.0.40
codegen_flags: <defaults>
</compile_context>

<pallas_src>
import math

import jax
import jax.numpy as jnp
import numpy as np
from jax import lax
from jax.experimental import pallas as pl
from jax.experimental.pallas import tpu as pltpu


def _head_group_size(H: int, hd: int) -> int:
    """Largest divisor G of H with G*hd <= 128 lanes (lane-dense group writes)."""
    best = 1
    for g in range(1, H + 1):
        if H % g == 0 and g * hd <= 128:
            best = g
    return best


def _choose_l_tile(L: int) -> int:
    # TODO(synk): for CLIP seq lens (77/197/257) pad L to a multiple of 8
    # (ideally 128) in the wrapper and mask padded keys with -inf before softmax.
    for tl in (256, 128):
        if L % tl == 0 and L // tl > 1:
            return tl
    return L


def _physical_vmem_bytes() -> int:
    try:
        return int(pltpu.get_tpu_info().vmem_capacity_bytes)
    except Exception:
        return 64 * 1024 * 1024  # v7x per-TC size: safe lower bound


def _make_kernel(L: int, D: int, H: int, TL: int, n_l_tiles: int):
    hd = D // H
    G = _head_group_size(H, hd)
    ghd = G * hd
    n_groups = H // G
    eps = 1e-5
    f32, bf16 = jnp.float32, jnp.bfloat16

    def kernel(x_ref, ln1_w_ref, ln1_b_ref, wq_ref, bq_ref, wkv_ref, bkv_ref,
               wo_ref, bo_ref, ln2_w_ref, ln2_b_ref, wfc_ref, bfc_ref,
               wproj_ref, bproj_ref, o_ref, q_s, kv_s, attn_s):

        def layernorm(v, w_ref, b_ref):
            # fp32 LayerNorm (matches the fp16-safe LayerNorm subclass).
            mu = jnp.mean(v, axis=-1, keepdims=True)
            var = jnp.mean((v - mu) ** 2, axis=-1, keepdims=True)
            return (v - mu) * lax.rsqrt(var + eps) * w_ref[...] + b_ref[...]

        # ---------------- attention branch ----------------
        # K/V over the FULL sequence (recomputed per q-tile; cheap for small
        # tile counts and keeps both grid axes stateless -> 'parallel').
        x_full = x_ref[...].astype(f32)                               # (L, D)
        y_full = layernorm(x_full, ln1_w_ref, ln1_b_ref)
        kv = jnp.dot(y_full.astype(bf16), wkv_ref[...],
                     preferred_element_type=f32) + bkv_ref[...]       # (L, 2D)
        kv_s[...] = kv.astype(bf16)

        # q-tile rows of x / LN1(x)
        if n_l_tiles == 1:
            x_tile, y_tile = x_full, y_full
        else:
            row0 = pl.multiple_of(pl.program_id(1) * TL, TL)
            x_tile = x_ref[pl.ds(row0, TL), :].astype(f32)            # (TL, D)
            y_tile = layernorm(x_tile, ln1_w_ref, ln1_b_ref)

        # NOTE: 1/sqrt(head_dim) is pre-folded into wq/bq at prep time.
        q = jnp.dot(y_tile.astype(bf16), wq_ref[...],
                    preferred_element_type=f32) + bq_ref[...]         # (TL, D)
        q_s[...] = q.astype(bf16)

        # Per-head-group attention; each group's G heads are written as one
        # lane-dense (TL, G*hd) bf16 slab so the out-proj is a single K=D matmul.
        # TODO(synk): optional attn_mask (None in this block's forward) not implemented.
        def head_group(g):
            base = g * ghd
            if not isinstance(base, int):
                base = pl.multiple_of(base, ghd)
            q_g = q_s[:, pl.ds(base, ghd)]                            # (TL, ghd)
            k_g = kv_s[:, pl.ds(base, ghd)]                           # (L,  ghd)
            v_g = kv_s[:, pl.ds(D + base, ghd)]                       # (L,  ghd)
            outs = []
            for j in range(G):                                        # small G unroll
                sl = slice(j * hd, (j + 1) * hd)
                qh, kh, vh = q_g[:, sl], k_g[:, sl], v_g[:, sl]
                # Contract last dims directly -> no kh transpose materialized.
                s = lax.dot_general(qh, kh, (((1,), (1,)), ((), ())),
                                    preferred_element_type=f32)       # (TL, L)
                s = s - jnp.max(s, axis=-1, keepdims=True)
                p = jnp.exp(s)
                p = p * pl.reciprocal(jnp.sum(p, axis=-1, keepdims=True),
                                      approx=True)
                outs.append(jnp.dot(p.astype(bf16), vh,
                                    preferred_element_type=f32))
            grp = outs[0] if G == 1 else jnp.concatenate(outs, axis=-1)
            attn_s[:, pl.ds(base, ghd)] = grp.astype(bf16)

        if n_groups == 1:
            head_group(0)
        else:
            def body(g, carry):
                head_group(g)
                return carry
            lax.fori_loop(0, n_groups, body, 0, unroll=min(2, n_groups))

        attn_out = jnp.dot(attn_s[...], wo_ref[...],
                           preferred_element_type=f32) + bo_ref[...]  # (TL, D)
        x1 = x_tile + attn_out                                        # residual 1

        # ---------------- MLP branch ----------------
        z = layernorm(x1, ln2_w_ref, ln2_b_ref)
        hfc = jnp.dot(z.astype(bf16), wfc_ref[...],
                      preferred_element_type=f32) + bfc_ref[...]      # (TL, 4D)
        hb = hfc.astype(bf16)
        # QuickGELU in bf16 (bf16 VPU/EUP on v6e/v7x).
        # TODO(synk): keep this in fp32 on v5e (no bf16 VPU/EUP there).
        hb = hb * jax.nn.sigmoid(1.702 * hb)
        m = jnp.dot(hb, wproj_ref[...],
                    preferred_element_type=f32) + bproj_ref[...]      # (TL, D)

        o_ref[...] = (x1 + m).astype(o_ref.dtype)                     # residual 2

    return kernel


def prepare_params(params):
    """One-time transform of PyTorch-layout params for the kernel.

    * linear weights transposed to (in, out) and cast to bf16 (MXU operands)
    * biases / LayerNorm params kept fp32, reshaped to (1, n) row vectors
    * in-projection split into q and kv parts; 1/sqrt(head_dim) folded into q
    """
    D = params["ln1_w"].shape[0]
    H = int(params["n_head"])
    hd = D // H
    scale = 1.0 / math.sqrt(hd)

    w_in = params["w_qkv"]                      # (3D, D) torch (out, in)
    b_in = params["b_qkv"]                      # (3D,)
    w_q, b_q = w_in[:D] * scale, b_in[:D] * scale
    w_kv, b_kv = w_in[D:], b_in[D:]

    f32, bf16 = jnp.float32, jnp.bfloat16
    return {
        "n_head": H,
        "ln1_w": params["ln1_w"].reshape(1, D).astype(f32),
        "ln1_b": params["ln1_b"].reshape(1, D).astype(f32),
        "w_q": w_q.T.astype(bf16),                     # (D, D)
        "b_q": b_q.reshape(1, D).astype(f32),
        "w_kv": w_kv.T.astype(bf16),                   # (D, 2D)
        "b_kv": b_kv.reshape(1, 2 * D).astype(f32),
        "w_out": params["w_out"].T.astype(bf16),       # (D, D)
        "b_out": params["b_out"].reshape(1, D).astype(f32),
        "ln2_w": params["ln2_w"].reshape(1, D).astype(f32),
        "ln2_b": params["ln2_b"].reshape(1, D).astype(f32),
        "w_fc": params["w_fc"].T.astype(bf16),         # (D, 4D)
        "b_fc": params["b_fc"].reshape(1, 4 * D).astype(f32),
        "w_proj": params["w_proj"].T.astype(bf16),     # (4D, D)
        "b_proj": params["b_proj"].reshape(1, D).astype(f32),
    }


_WEIGHT_KEYS = ("ln1_w", "ln1_b", "w_q", "b_q", "w_kv", "b_kv", "w_out", "b_out",
                "ln2_w", "ln2_b", "w_fc", "b_fc", "w_proj", "b_proj")


def residual_attention_block(x_lnd, prepared):
    """x_lnd: (L, N, D) fp32, PyTorch MultiheadAttention seq-first layout."""
    L, N, D = x_lnd.shape
    H = prepared["n_head"]
    assert D % H == 0
    hd = D // H
    TL = _choose_l_tile(L)
    n_l_tiles = L // TL
    G = _head_group_size(H, hd)

    x = jnp.transpose(x_lnd, (1, 0, 2))                # (N, L, D)
    weights = [prepared[k] for k in _WEIGHT_KEYS]      # all 2-D, prepped once

    kernel = _make_kernel(L, D, H, TL, n_l_tiles)

    # --- advisory cost estimate for the XLA scheduler ---
    flops = 2 * N * L * D * (12 * D + 2 * L) + (n_l_tiles - 1) * 4 * N * L * D * D
    transcendentals = N * (H * L * L + H * L * n_l_tiles + 4 * L * D)
    weight_bytes = sum(int(np.prod(w.shape)) * w.dtype.itemsize for w in weights)
    bytes_accessed = 2 * N * L * D * 4 + weight_bytes
    cost = pl.CostEstimate(flops=int(flops), transcendentals=int(transcendentals),
                           bytes_accessed=int(bytes_accessed))

    # --- VMEM budget (weights single-buffered, bf16 scratch, f32 live vals) ---
    scr_bytes = (TL * D + L * 2 * D + TL * D) * 2
    act_bytes = (L * 3 * D + TL * 9 * D + 2 * G * TL * L) * 4
    xo_bytes = 2 * L * D * 4 + 2 * TL * D * 4
    phys = _physical_vmem_bytes()

    def build_and_call(single_buffer_weights: bool):
        wbuf = weight_bytes * (1 if single_buffer_weights else 2)
        vmem_needed = wbuf + xo_bytes + scr_bytes + act_bytes
        # Cap at ~85% of physical VMEM (v6e: ~108 MiB, v7x: ~54 MiB) -> headroom
        # for Mosaic internal scratch; never request the full physical size.
        vmem_limit = int(min(max(32 * 1024 * 1024, int(1.3 * vmem_needed)),
                             int(0.85 * phys)))

        def weight_spec(arr):
            if single_buffer_weights:
                # Constant index_map across the grid: double-buffering only
                # doubles VMEM without hiding any DMA -> single-buffer it.
                return pl.BlockSpec(arr.shape, lambda b, t: (0, 0),
                                    pipeline_mode=pl.Buffered(1))
            return pl.BlockSpec(arr.shape, lambda b, t: (0, 0))

        return pl.pallas_call(
            kernel,
            out_shape=jax.ShapeDtypeStruct((N, L, D), x.dtype),
            grid=(N, n_l_tiles),
            in_specs=[pl.BlockSpec((None, L, D), lambda b, t: (b, 0, 0))]
                     + [weight_spec(w) for w in weights],
            out_specs=pl.BlockSpec((None, TL, D), lambda b, t: (b, t, 0)),
            scratch_shapes=[pltpu.VMEM((TL, D), jnp.bfloat16),       # q (tile)
                            pltpu.VMEM((L, 2 * D), jnp.bfloat16),    # k | v (full)
                            pltpu.VMEM((TL, D), jnp.bfloat16)],      # attn heads
            compiler_params=pltpu.CompilerParams(
                dimension_semantics=("parallel", "parallel"),
                vmem_limit_bytes=vmem_limit),
            cost_estimate=cost,
        )(x, *weights)

    try:
        out = jax.block_until_ready(build_and_call(True))
    except Exception:
        # Fallback if pipeline_mode=pl.Buffered(1) is unsupported on this jax.
        out = jax.block_until_ready(build_and_call(False))

    return jnp.transpose(out, (1, 0, 2))               # back to (L, N, D)


def reference(x_lnd, params):
    """Pure-JAX fp32 reference matching PyTorch semantics (attn_mask=None)."""
    L, N, D = x_lnd.shape
    H = params["n_head"]
    hd = D // H

    def ln(v, w, b):
        mu = v.mean(-1, keepdims=True)
        var = ((v - mu) ** 2).mean(-1, keepdims=True)
        return (v - mu) / jnp.sqrt(var + 1e-5) * w + b

    x = x_lnd
    y = ln(x, params["ln1_w"], params["ln1_b"])
    qkv = y @ params["w_qkv"].T + params["b_qkv"]       # (L, N, 3D)
    q, k, v = jnp.split(qkv, 3, axis=-1)
    q = q * (hd ** -0.5)

    def to_heads(t):
        return t.reshape(L, N, H, hd).transpose(1, 2, 0, 3)   # (N, H, L, hd)

    qh, kh, vh = map(to_heads, (q, k, v))
    s = jnp.einsum("nhld,nhmd->nhlm", qh, kh)
    p = jax.nn.softmax(s, axis=-1)
    o = jnp.einsum("nhlm,nhmd->nhld", p, vh)
    o = o.transpose(2, 0, 1, 3).reshape(L, N, D)
    attn = o @ params["w_out"].T + params["b_out"]
    x = x + attn
    z = ln(x, params["ln2_w"], params["ln2_b"])
    hm = z @ params["w_fc"].T + params["b_fc"]
    hm = hm * jax.nn.sigmoid(1.702 * hm)
    m = hm @ params["w_proj"].T + params["b_proj"]
    return x + m


def init_params(key, D, H):
    ks = jax.random.split(key, 12)
    n = lambda k, shape, s=0.02: (s * jax.random.normal(k, shape)).astype(jnp.float32)
    return {
        "n_head": H,
        "ln1_w": jnp.ones((D,), jnp.float32),
        "ln1_b": n(ks[0], (D,)),
        "w_qkv": n(ks[1], (3 * D, D)),      # nn.MultiheadAttention in_proj_weight
        "b_qkv": n(ks[2], (3 * D,)),
        "w_out": n(ks[3], (D, D)),          # out_proj
        "b_out": n(ks[4], (D,)),
        "ln2_w": jnp.ones((D,), jnp.float32),
        "ln2_b": n(ks[5], (D,)),
        "w_fc": n(ks[6], (4 * D, D)),       # mlp.c_fc
        "b_fc": n(ks[7], (4 * D,)),
        "w_proj": n(ks[8], (D, 4 * D)),     # mlp.c_proj
        "b_proj": n(ks[9], (D,)),
    }


def _run_case(seed, L, N, D, H):
    key = jax.random.PRNGKey(seed)
    kx, kp = jax.random.split(key)
    x = jax.random.normal(kx, (L, N, D), dtype=jnp.float32)
    params = init_params(kp, D, H)
    prepared = prepare_params(params)       # one-time weight prep, reused per call
    out = jax.block_until_ready(residual_attention_block(x, prepared))
    ref = jax.block_until_ready(reference(x, params))
    np.testing.assert_allclose(np.asarray(out), np.asarray(ref), atol=5e-2, rtol=5e-2)


if __name__ == "__main__":
    # Small primary case: seq=8, batch=2, d_model=32, n_head=4 (single head group).
    _run_case(0, L=8, N=2, D=32, H=4)
    # Secondary case exercising the head-group fori_loop (hd=64 -> G=2) and the
    # L-tile grid axis (L=256 -> two 128-row q tiles).
    _run_case(0, L=256, N=1, D=512, H=8)
    print("KERNEL_OK")
</pallas_src>

<mosaic_0001>
module attributes {stable_mosaic.version = 11 : i64} {
  func.func @kernel(%arg0: i32, %arg1: i32, %arg2: memref<1x8x32xf32, #tpu.memory_space<vmem>>, %arg3: memref<1x32xf32, #tpu.memory_space<vmem>>, %arg4: memref<1x32xf32, #tpu.memory_space<vmem>>, %arg5: memref<32x32xbf16, #tpu.memory_space<vmem>>, %arg6: memref<1x32xf32, #tpu.memory_space<vmem>>, %arg7: memref<32x64xbf16, #tpu.memory_space<vmem>>, %arg8: memref<1x64xf32, #tpu.memory_space<vmem>>, %arg9: memref<32x32xbf16, #tpu.memory_space<vmem>>, %arg10: memref<1x32xf32, #tpu.memory_space<vmem>>, %arg11: memref<1x32xf32, #tpu.memory_space<vmem>>, %arg12: memref<1x32xf32, #tpu.memory_space<vmem>>, %arg13: memref<32x128xbf16, #tpu.memory_space<vmem>>, %arg14: memref<1x128xf32, #tpu.memory_space<vmem>>, %arg15: memref<128x32xbf16, #tpu.memory_space<vmem>>, %arg16: memref<1x32xf32, #tpu.memory_space<vmem>>, %arg17: memref<1x8x32xf32, #tpu.memory_space<vmem>>, %arg18: memref<8x32xbf16, #tpu.memory_space<vmem>>, %arg19: memref<8x64xbf16, #tpu.memory_space<vmem>>, %arg20: memref<8x32xbf16, #tpu.memory_space<vmem>>) attributes {dimension_semantics = [#tpu.dimension_semantics<parallel>, #tpu.dimension_semantics<parallel>], iteration_bounds = array<i64: 2, 1>, scalar_prefetch = 0 : i64, scratch_operands = 3 : i64, tpu.core_type = #tpu.core_type<tc>, window_params = [{transform_indices = @transform_0, window_bounds = array<i64: 1, 8, 32>}, {pipeline_mode = #tpu.pipeline_mode<synchronous>, transform_indices = @transform_1, window_bounds = array<i64: 1, 32>}, {pipeline_mode = #tpu.pipeline_mode<synchronous>, transform_indices = @transform_2, window_bounds = array<i64: 1, 32>}, {pipeline_mode = #tpu.pipeline_mode<synchronous>, transform_indices = @transform_3, window_bounds = array<i64: 32, 32>}, {pipeline_mode = #tpu.pipeline_mode<synchronous>, transform_indices = @transform_4, window_bounds = array<i64: 1, 32>}, {pipeline_mode = #tpu.pipeline_mode<synchronous>, transform_indices = @transform_5, window_bounds = array<i64: 32, 64>}, {pipeline_mode = #tpu.pipeline_mode<synchronous>, transform_indices = @transform_6, window_bounds = array<i64: 1, 64>}, {pipeline_mode = #tpu.pipeline_mode<synchronous>, transform_indices = @transform_7, window_bounds = array<i64: 32, 32>}, {pipeline_mode = #tpu.pipeline_mode<synchronous>, transform_indices = @transform_8, window_bounds = array<i64: 1, 32>}, {pipeline_mode = #tpu.pipeline_mode<synchronous>, transform_indices = @transform_9, window_bounds = array<i64: 1, 32>}, {pipeline_mode = #tpu.pipeline_mode<synchronous>, transform_indices = @transform_10, window_bounds = array<i64: 1, 32>}, {pipeline_mode = #tpu.pipeline_mode<synchronous>, transform_indices = @transform_11, window_bounds = array<i64: 32, 128>}, {pipeline_mode = #tpu.pipeline_mode<synchronous>, transform_indices = @transform_12, window_bounds = array<i64: 1, 128>}, {pipeline_mode = #tpu.pipeline_mode<synchronous>, transform_indices = @transform_13, window_bounds = array<i64: 128, 32>}, {pipeline_mode = #tpu.pipeline_mode<synchronous>, transform_indices = @transform_14, window_bounds = array<i64: 1, 32>}, {transform_indices = @transform_15, window_bounds = array<i64: 1, 8, 32>}]} {
    %c0 = arith.constant 0 : index
    %c0_0 = arith.constant 0 : index
    %c0_1 = arith.constant 0 : index
    %0 = vector.load %arg2[%c0, %c0_0, %c0_1] : memref<1x8x32xf32, #tpu.memory_space<vmem>>, vector<1x8x32xf32>
    %1 = vector.shape_cast %0 : vector<1x8x32xf32> to vector<8x32xf32>
    %cst = arith.constant dense<0.000000e+00> : vector<8xf32>
    %2 = vector.multi_reduction <add>, %1, %cst [1] : vector<8x32xf32> to vector<8xf32>
    %3 = vector.shape_cast %2 : vector<8xf32> to vector<8x1xf32>
    %cst_2 = arith.constant 3.200000e+01 : f32
    %4 = vector.broadcast %cst_2 : f32 to vector<8x1xf32>
    %5 = arith.divf %3, %4 : vector<8x1xf32>
    %6 = vector.broadcast %5 : vector<8x1xf32> to vector<8x32xf32>
    %7 = arith.subf %1, %6 : vector<8x32xf32>
    %8 = arith.mulf %7, %7 : vector<8x32xf32>
    %cst_3 = arith.constant dense<0.000000e+00> : vector<8xf32>
    %9 = vector.multi_reduction <add>, %8, %cst_3 [1] : vector<8x32xf32> to vector<8xf32>
    %10 = vector.shape_cast %9 : vector<8xf32> to vector<8x1xf32>
    %cst_4 = arith.constant 3.200000e+01 : f32
    %11 = vector.broadcast %cst_4 : f32 to vector<8x1xf32>
    %12 = arith.divf %10, %11 : vector<8x1xf32>
    %13 = vector.broadcast %5 : vector<8x1xf32> to vector<8x32xf32>
    %14 = arith.subf %1, %13 : vector<8x32xf32>
    %cst_5 = arith.constant 9.99999974E-6 : f32
    %15 = vector.broadcast %cst_5 : f32 to vector<8x1xf32>
    %16 = arith.addf %12, %15 : vector<8x1xf32>
    %17 = math.rsqrt %16 : vector<8x1xf32>
    %18 = vector.broadcast %17 : vector<8x1xf32> to vector<8x32xf32>
    %19 = arith.mulf %14, %18 : vector<8x32xf32>
    %c0_6 = arith.constant 0 : index
    %c0_7 = arith.constant 0 : index
    %20 = vector.load %arg3[%c0_6, %c0_7] : memref<1x32xf32, #tpu.memory_space<vmem>>, vector<1x32xf32>
    %21 = vector.broadcast %20 : vector<1x32xf32> to vector<8x32xf32>
    %22 = arith.mulf %19, %21 : vector<8x32xf32>
    %c0_8 = arith.constant 0 : index
    %c0_9 = arith.constant 0 : index
    %23 = vector.load %arg4[%c0_8, %c0_9] : memref<1x32xf32, #tpu.memory_space<vmem>>, vector<1x32xf32>
    %24 = vector.broadcast %23 : vector<1x32xf32> to vector<8x32xf32>
    %25 = arith.addf %22, %24 : vector<8x32xf32>
    %26 = arith.truncf %25 : vector<8x32xf32> to vector<8x32xbf16>
    %c0_10 = arith.constant 0 : index
    %c0_11 = arith.constant 0 : index
    %27 = vector.load %arg7[%c0_10, %c0_11] : memref<32x64xbf16, #tpu.memory_space<vmem>>, vector<32x64xbf16>
    %cst_12 = arith.constant dense<0.000000e+00> : vector<8x64xf32>
    %28 = tpu.matmul %26, %27, %cst_12 {dimension_numbers = #tpu.dot_dimension_numbers<[1], [0], [0], [1], [0, 0, 1, 1], [], []>} : vector<8x32xbf16>, vector<32x64xbf16>, vector<8x64xf32> -> vector<8x64xf32>
    %c0_13 = arith.constant 0 : index
    %c0_14 = arith.constant 0 : index
    %29 = vector.load %arg8[%c0_13, %c0_14] : memref<1x64xf32, #tpu.memory_space<vmem>>, vector<1x64xf32>
    %30 = vector.broadcast %29 : vector<1x64xf32> to vector<8x64xf32>
    %31 = arith.addf %28, %30 : vector<8x64xf32>
    %32 = arith.truncf %31 : vector<8x64xf32> to vector<8x64xbf16>
    %c0_15 = arith.constant 0 : index
    %c0_16 = arith.constant 0 : index
    %33 = vector.load %arg19[%c0_15, %c0_16] : memref<8x64xbf16, #tpu.memory_space<vmem>>, vector<8x64xbf16>
    tpu.vector_store %arg19[%c0_15, %c0_16], %32 {strides = array<i32>} : memref<8x64xbf16, #tpu.memory_space<vmem>>, vector<8x64xbf16>,
    %34 = arith.truncf %25 : vector<8x32xf32> to vector<8x32xbf16>
    %c0_17 = arith.constant 0 : index
    %c0_18 = arith.constant 0 : index
    %35 = vector.load %arg5[%c0_17, %c0_18] : memref<32x32xbf16, #tpu.memory_space<vmem>>, vector<32x32xbf16>
    %cst_19 = arith.constant dense<0.000000e+00> : vector<8x32xf32>
    %36 = tpu.matmul %34, %35, %cst_19 {dimension_numbers = #tpu.dot_dimension_numbers<[1], [0], [0], [1], [0, 0, 1, 1], [], []>} : vector<8x32xbf16>, vector<32x32xbf16>, vector<8x32xf32> -> vector<8x32xf32>
    %c0_20 = arith.constant 0 : index
    %c0_21 = arith.constant 0 : index
    %37 = vector.load %arg6[%c0_20, %c0_21] : memref<1x32xf32, #tpu.memory_space<vmem>>, vector<1x32xf32>
    %38 = vector.broadcast %37 : vector<1x32xf32> to vector<8x32xf32>
    %39 = arith.addf %36, %38 : vector<8x32xf32>
    %40 = arith.truncf %39 : vector<8x32xf32> to vector<8x32xbf16>
    %c0_22 = arith.constant 0 : index
    %c0_23 = arith.constant 0 : index
    %41 = vector.load %arg18[%c0_22, %c0_23] : memref<8x32xbf16, #tpu.memory_space<vmem>>, vector<8x32xbf16>
    tpu.vector_store %arg18[%c0_22, %c0_23], %40 {strides = array<i32>} : memref<8x32xbf16, #tpu.memory_space<vmem>>, vector<8x32xbf16>,
    %c0_24 = arith.constant 0 : index
    %c0_25 = arith.constant 0 : index
    %42 = vector.load %arg18[%c0_24, %c0_25] : memref<8x32xbf16, #tpu.memory_space<vmem>>, vector<8x32xbf16>
    %c0_26 = arith.constant 0 : index
    %c0_27 = arith.constant 0 : index
    %43 = vector.load %arg19[%c0_26, %c0_27] : memref<8x64xbf16, #tpu.memory_space<vmem>>, vector<8x32xbf16>
    %c0_28 = arith.constant 0 : index
    %c32 = arith.constant 32 : index
    %44 = vector.load %arg19[%c0_28, %c32] : memref<8x64xbf16, #tpu.memory_space<vmem>>, vector<8x32xbf16>
    %45 = vector.extract_strided_slice %42 {offsets = [0, 0], sizes = [8, 8], strides = [1, 1]} : vector<8x32xbf16> to vector<8x8xbf16>
    %46 = vector.extract_strided_slice %43 {offsets = [0, 0], sizes = [8, 8], strides = [1, 1]} : vector<8x32xbf16> to vector<8x8xbf16>
    %47 = vector.extract_strided_slice %44 {offsets = [0, 0], sizes = [8, 8], strides = [1, 1]} : vector<8x32xbf16> to vector<8x8xbf16>
    %cst_29 = arith.constant dense<0.000000e+00> : vector<8x8xf32>
    %48 = tpu.matmul %45, %46, %cst_29 {dimension_numbers = #tpu.dot_dimension_numbers<[1], [1], [0], [0], [0, 0, 1, 0], [], []>} : vector<8x8xbf16>, vector<8x8xbf16>, vector<8x8xf32> -> vector<8x8xf32>
    %cst_30 = arith.constant dense<0xFF800000> : vector<8xf32>
    %49 = vector.multi_reduction <maximumf>, %48, %cst_30 [1] : vector<8x8xf32> to vector<8xf32>
    %50 = vector.shape_cast %49 : vector<8xf32> to vector<8x1xf32>
    %51 = vector.broadcast %50 : vector<8x1xf32> to vector<8x8xf32>
    %52 = arith.subf %48, %51 : vector<8x8xf32>
    %53 = math.exp %52 : vector<8x8xf32>
    %cst_31 = arith.constant dense<0.000000e+00> : vector<8xf32>
    %54 = vector.multi_reduction <add>, %53, %cst_31 [1] : vector<8x8xf32> to vector<8xf32>
    %55 = vector.shape_cast %54 : vector<8xf32> to vector<8x1xf32>
    %56 = tpu.reciprocal %55 {approx = true} : vector<8x1xf32> -> vector<8x1xf32>
    %57 = vector.broadcast %56 : vector<8x1xf32> to vector<8x8xf32>
    %58 = arith.mulf %53, %57 : vector<8x8xf32>
    %59 = arith.truncf %58 : vector<8x8xf32> to vector<8x8xbf16>
    %cst_32 = arith.constant dense<0.000000e+00> : vector<8x8xf32>
    %60 = tpu.matmul %59, %47, %cst_32 {dimension_numbers = #tpu.dot_dimension_numbers<[1], [0], [0], [1], [0, 0, 1, 1], [], []>} : vector<8x8xbf16>, vector<8x8xbf16>, vector<8x8xf32> -> vector<8x8xf32>
    %61 = vector.extract_strided_slice %42 {offsets = [0, 8], sizes = [8, 8], strides = [1, 1]} : vector<8x32xbf16> to vector<8x8xbf16>
    %62 = vector.extract_strided_slice %43 {offsets = [0, 8], sizes = [8, 8], strides = [1, 1]} : vector<8x32xbf16> to vector<8x8xbf16>
    %63 = vector.extract_strided_slice %44 {offsets = [0, 8], sizes = [8, 8], strides = [1, 1]} : vector<8x32xbf16> to vector<8x8xbf16>
    %cst_33 = arith.constant dense<0.000000e+00> : vector<8x8xf32>
    %64 = tpu.matmul %61, %62, %cst_33 {dimension_numbers = #tpu.dot_dimension_numbers<[1], [1], [0], [0], [0, 0, 1, 0], [], []>} : vector<8x8xbf16>, vector<8x8xbf16>, vector<8x8xf32> -> vector<8x8xf32>
    %cst_34 = arith.constant dense<0xFF800000> : vector<8xf32>
    %65 = vector.multi_reduction <maximumf>, %64, %cst_34 [1] : vector<8x8xf32> to vector<8xf32>
    %66 = vector.shape_cast %65 : vector<8xf32> to vector<8x1xf32>
    %67 = vector.broadcast %66 : vector<8x1xf32> to vector<8x8xf32>
    %68 = arith.subf %64, %67 : vector<8x8xf32>
    %69 = math.exp %68 : vector<8x8xf32>
    %cst_35 = arith.constant dense<0.000000e+00> : vector<8xf32>
    %70 = vector.multi_reduction <add>, %69, %cst_35 [1] : vector<8x8xf32> to vector<8xf32>
    %71 = vector.shape_cast %70 : vector<8xf32> to vector<8x1xf32>
    %72 = tpu.reciprocal %71 {approx = true} : vector<8x1xf32> -> vector<8x1xf32>
    %73 = vector.broadcast %72 : vector<8x1xf32> to vector<8x8xf32>
    %74 = arith.mulf %69, %73 : vector<8x8xf32>
    %75 = arith.truncf %74 : vector<8x8xf32> to vector<8x8xbf16>
    %cst_36 = arith.constant dense<0.000000e+00> : vector<8x8xf32>
    %76 = tpu.matmul %75, %63, %cst_36 {dimension_numbers = #tpu.dot_dimension_numbers<[1], [0], [0], [1], [0, 0, 1, 1], [], []>} : vector<8x8xbf16>, vector<8x8xbf16>, vector<8x8xf32> -> vector<8x8xf32>
    %77 = vector.extract_strided_slice %42 {offsets = [0, 16], sizes = [8, 8], strides = [1, 1]} : vector<8x32xbf16> to vector<8x8xbf16>
    %78 = vector.extract_strided_slice %43 {offsets = [0, 16], sizes = [8, 8], strides = [1, 1]} : vector<8x32xbf16> to vector<8x8xbf16>
    %79 = vector.extract_strided_slice %44 {offsets = [0, 16], sizes = [8, 8], strides = [1, 1]} : vector<8x32xbf16> to vector<8x8xbf16>
    %cst_37 = arith.constant dense<0.000000e+00> : vector<8x8xf32>
    %80 = tpu.matmul %77, %78, %cst_37 {dimension_numbers = #tpu.dot_dimension_numbers<[1], [1], [0], [0], [0, 0, 1, 0], [], []>} : vector<8x8xbf16>, vector<8x8xbf16>, vector<8x8xf32> -> vector<8x8xf32>
    %cst_38 = arith.constant dense<0xFF800000> : vector<8xf32>
    %81 = vector.multi_reduction <maximumf>, %80, %cst_38 [1] : vector<8x8xf32> to vector<8xf32>
    %82 = vector.shape_cast %81 : vector<8xf32> to vector<8x1xf32>
    %83 = vector.broadcast %82 : vector<8x1xf32> to vector<8x8xf32>
    %84 = arith.subf %80, %83 : vector<8x8xf32>
    %85 = math.exp %84 : vector<8x8xf32>
    %cst_39 = arith.constant dense<0.000000e+00> : vector<8xf32>
    %86 = vector.multi_reduction <add>, %85, %cst_39 [1] : vector<8x8xf32> to vector<8xf32>
    %87 = vector.shape_cast %86 : vector<8xf32> to vector<8x1xf32>
    %88 = tpu.reciprocal %87 {approx = true} : vector<8x1xf32> -> vector<8x1xf32>
    %89 = vector.broadcast %88 : vector<8x1xf32> to vector<8x8xf32>
    %90 = arith.mulf %85, %89 : vector<8x8xf32>
    %91 = arith.truncf %90 : vector<8x8xf32> to vector<8x8xbf16>
    %cst_40 = arith.constant dense<0.000000e+00> : vector<8x8xf32>
    %92 = tpu.matmul %91, %79, %cst_40 {dimension_numbers = #tpu.dot_dimension_numbers<[1], [0], [0], [1], [0, 0, 1, 1], [], []>} : vector<8x8xbf16>, vector<8x8xbf16>, vector<8x8xf32> -> vector<8x8xf32>
    %93 = vector.extract_strided_slice %42 {offsets = [0, 24], sizes = [8, 8], strides = [1, 1]} : vector<8x32xbf16> to vector<8x8xbf16>
    %94 = vector.extract_strided_slice %43 {offsets = [0, 24], sizes = [8, 8], strides = [1, 1]} : vector<8x32xbf16> to vector<8x8xbf16>
    %95 = vector.extract_strided_slice %44 {offsets = [0, 24], sizes = [8, 8], strides = [1, 1]} : vector<8x32xbf16> to vector<8x8xbf16>
    %cst_41 = arith.constant dense<0.000000e+00> : vector<8x8xf32>
    %96 = tpu.matmul %93, %94, %cst_41 {dimension_numbers = #tpu.dot_dimension_numbers<[1], [1], [0], [0], [0, 0, 1, 0], [], []>} : vector<8x8xbf16>, vector<8x8xbf16>, vector<8x8xf32> -> vector<8x8xf32>
    %cst_42 = arith.constant dense<0xFF800000> : vector<8xf32>
    %97 = vector.multi_reduction <maximumf>, %96, %cst_42 [1] : vector<8x8xf32> to vector<8xf32>
    %98 = vector.shape_cast %97 : vector<8xf32> to vector<8x1xf32>
    %99 = vector.broadcast %98 : vector<8x1xf32> to vector<8x8xf32>
    %100 = arith.subf %96, %99 : vector<8x8xf32>
    %101 = math.exp %100 : vector<8x8xf32>
    %cst_43 = arith.constant dense<0.000000e+00> : vector<8xf32>
    %102 = vector.multi_reduction <add>, %101, %cst_43 [1] : vector<8x8xf32> to vector<8xf32>
    %103 = vector.shape_cast %102 : vector<8xf32> to vector<8x1xf32>
    %104 = tpu.reciprocal %103 {approx = true} : vector<8x1xf32> -> vector<8x1xf32>
    %105 = vector.broadcast %104 : vector<8x1xf32> to vector<8x8xf32>
    %106 = arith.mulf %101, %105 : vector<8x8xf32>
    %107 = arith.truncf %106 : vector<8x8xf32> to vector<8x8xbf16>
    %cst_44 = arith.constant dense<0.000000e+00> : vector<8x8xf32>
    %108 = tpu.matmul %107, %95, %cst_44 {dimension_numbers = #tpu.dot_dimension_numbers<[1], [0], [0], [1], [0, 0, 1, 1], [], []>} : vector<8x8xbf16>, vector<8x8xbf16>, vector<8x8xf32> -> vector<8x8xf32>
    %109 = tpu.concatenate %60, %76, %92, %108 in 1 : vector<8x8xf32>, vector<8x8xf32>, vector<8x8xf32>, vector<8x8xf32> -> vector<8x32xf32>
    %110 = arith.truncf %109 : vector<8x32xf32> to vector<8x32xbf16>
    %c0_45 = arith.constant 0 : index
    %c0_46 = arith.constant 0 : index
    %111 = vector.load %arg20[%c0_45, %c0_46] : memref<8x32xbf16, #tpu.memory_space<vmem>>, vector<8x32xbf16>
    tpu.vector_store %arg20[%c0_45, %c0_46], %110 {strides = array<i32>} : memref<8x32xbf16, #tpu.memory_space<vmem>>, vector<8x32xbf16>,
    %c0_47 = arith.constant 0 : index
    %c0_48 = arith.constant 0 : index
    %112 = vector.load %arg20[%c0_47, %c0_48] : memref<8x32xbf16, #tpu.memory_space<vmem>>, vector<8x32xbf16>
    %c0_49 = arith.constant 0 : index
    %c0_50 = arith.constant 0 : index
    %113 = vector.load %arg9[%c0_49, %c0_50] : memref<32x32xbf16, #tpu.memory_space<vmem>>, vector<32x32xbf16>
    %cst_51 = arith.constant dense<0.000000e+00> : vector<8x32xf32>
    %114 = tpu.matmul %112, %113, %cst_51 {dimension_numbers = #tpu.dot_dimension_numbers<[1], [0], [0], [1], [0, 0, 1, 1], [], []>} : vector<8x32xbf16>, vector<32x32xbf16>, vector<8x32xf32> -> vector<8x32xf32>
    %c0_52 = arith.constant 0 : index
    %c0_53 = arith.constant 0 : index
    %115 = vector.load %arg10[%c0_52, %c0_53] : memref<1x32xf32, #tpu.memory_space<vmem>>, vector<1x32xf32>
    %116 = vector.broadcast %115 : vector<1x32xf32> to vector<8x32xf32>
    %117 = arith.addf %114, %116 : vector<8x32xf32>
    %118 = arith.addf %1, %117 : vector<8x32xf32>
    %cst_54 = arith.constant dense<0.000000e+00> : vector<8xf32>
    %119 = vector.multi_reduction <add>, %118, %cst_54 [1] : vector<8x32xf32> to vector<8xf32>
    %120 = vector.shape_cast %119 : vector<8xf32> to vector<8x1xf32>
    %cst_55 = arith.constant 3.200000e+01 : f32
    %121 = vector.broadcast %cst_55 : f32 to vector<8x1xf32>
    %122 = arith.divf %120, %121 : vector<8x1xf32>
    %123 = vector.broadcast %122 : vector<8x1xf32> to vector<8x32xf32>
    %124 = arith.subf %118, %123 : vector<8x32xf32>
    %125 = arith.mulf %124, %124 : vector<8x32xf32>
    %cst_56 = arith.constant dense<0.000000e+00> : vector<8xf32>
    %126 = vector.multi_reduction <add>, %125, %cst_56 [1] : vector<8x32xf32> to vector<8xf32>
    %127 = vector.shape_cast %126 : vector<8xf32> to vector<8x1xf32>
    %cst_57 = arith.constant 3.200000e+01 : f32
    %128 = vector.broadcast %cst_57 : f32 to vector<8x1xf32>
    %129 = arith.divf %127, %128 : vector<8x1xf32>
    %130 = vector.broadcast %122 : vector<8x1xf32> to vector<8x32xf32>
    %131 = arith.subf %118, %130 : vector<8x32xf32>
    %cst_58 = arith.constant 9.99999974E-6 : f32
    %132 = vector.broadcast %cst_58 : f32 to vector<8x1xf32>
    %133 = arith.addf %129, %132 : vector<8x1xf32>
    %134 = math.rsqrt %133 : vector<8x1xf32>
    %135 = vector.broadcast %134 : vector<8x1xf32> to vector<8x32xf32>
    %136 = arith.mulf %131, %135 : vector<8x32xf32>
    %c0_59 = arith.constant 0 : index
    %c0_60 = arith.constant 0 : index
    %137 = vector.load %arg11[%c0_59, %c0_60] : memref<1x32xf32, #tpu.memory_space<vmem>>, vector<1x32xf32>
    %138 = vector.broadcast %137 : vector<1x32xf32> to vector<8x32xf32>
    %139 = arith.mulf %136, %138 : vector<8x32xf32>
    %c0_61 = arith.constant 0 : index
    %c0_62 = arith.constant 0 : index
    %140 = vector.load %arg12[%c0_61, %c0_62] : memref<1x32xf32, #tpu.memory_space<vmem>>, vector<1x32xf32>
    %141 = vector.broadcast %140 : vector<1x32xf32> to vector<8x32xf32>
    %142 = arith.addf %139, %141 : vector<8x32xf32>
    %143 = arith.truncf %142 : vector<8x32xf32> to vector<8x32xbf16>
    %c0_63 = arith.constant 0 : index
    %c0_64 = arith.constant 0 : index
    %144 = vector.load %arg13[%c0_63, %c0_64] : memref<32x128xbf16, #tpu.memory_space<vmem>>, vector<32x128xbf16>
    %cst_65 = arith.constant dense<0.000000e+00> : vector<8x128xf32>
    %145 = tpu.matmul %143, %144, %cst_65 {dimension_numbers = #tpu.dot_dimension_numbers<[1], [0], [0], [1], [0, 0, 1, 1], [], []>} : vector<8x32xbf16>, vector<32x128xbf16>, vector<8x128xf32> -> vector<8x128xf32>
    %c0_66 = arith.constant 0 : index
    %c0_67 = arith.constant 0 : index
    %146 = vector.load %arg14[%c0_66, %c0_67] : memref<1x128xf32, #tpu.memory_space<vmem>>, vector<1x128xf32>
    %147 = vector.broadcast %146 : vector<1x128xf32> to vector<8x128xf32>
    %148 = arith.addf %145, %147 : vector<8x128xf32>
    %149 = arith.truncf %148 : vector<8x128xf32> to vector<8x128xbf16>
    %cst_68 = arith.constant 1.703130e+00 : bf16
    %150 = vector.broadcast %cst_68 : bf16 to vector<8x128xbf16>
    %151 = arith.mulf %150, %149 : vector<8x128xbf16>
    %152 = arith.negf %151 : vector<8x128xbf16>
    %153 = math.exp %152 : vector<8x128xbf16>
    %cst_69 = arith.constant 1.000000e+00 : bf16
    %154 = vector.broadcast %cst_69 : bf16 to vector<8x128xbf16>
    %155 = arith.addf %154, %153 : vector<8x128xbf16>
    %156 = arith.divf %154, %155 : vector<8x128xbf16>
    %157 = arith.mulf %149, %156 : vector<8x128xbf16>
    %c0_70 = arith.constant 0 : index
    %c0_71 = arith.constant 0 : index
    %158 = vector.load %arg15[%c0_70, %c0_71] : memref<128x32xbf16, #tpu.memory_space<vmem>>, vector<128x32xbf16>
    %cst_72 = arith.constant dense<0.000000e+00> : vector<8x32xf32>
    %159 = tpu.matmul %157, %158, %cst_72 {dimension_numbers = #tpu.dot_dimension_numbers<[1], [0], [0], [1], [0, 0, 1, 1], [], []>} : vector<8x128xbf16>, vector<128x32xbf16>, vector<8x32xf32> -> vector<8x32xf32>
    %c0_73 = arith.constant 0 : index
    %c0_74 = arith.constant 0 : index
    %160 = vector.load %arg16[%c0_73, %c0_74] : memref<1x32xf32, #tpu.memory_space<vmem>>, vector<1x32xf32>
    %161 = vector.broadcast %160 : vector<1x32xf32> to vector<8x32xf32>
    %162 = arith.addf %159, %161 : vector<8x32xf32>
    %163 = arith.addf %118, %162 : vector<8x32xf32>
    %c0_75 = arith.constant 0 : index
    %c0_76 = arith.constant 0 : index
    %c0_77 = arith.constant 0 : index
    %164 = vector.load %arg17[%c0_75, %c0_76, %c0_77] : memref<1x8x32xf32, #tpu.memory_space<vmem>>, vector<1x8x32xf32>
    %165 = vector.shape_cast %164 : vector<1x8x32xf32> to vector<8x32xf32>
    %166 = vector.shape_cast %163 : vector<8x32xf32> to vector<1x8x32xf32>
    tpu.vector_store %arg17[%c0_75, %c0_76, %c0_77], %166 {strides = array<i32>} : memref<1x8x32xf32, #tpu.memory_space<vmem>>, vector<1x8x32xf32>,
    return
  }
  func.func @transform_0(%arg0: i32, %arg1: i32) -> (i32, i32, i32) {
    %c0_i32 = arith.constant 0 : i32
    %c0_i32_0 = arith.constant 0 : i32
    %c0_i32_1 = arith.constant 0 : i32
    return %arg0, %c0_i32, %c0_i32_0 : i32, i32, i32
  }
  func.func @transform_1(%arg0: i32, %arg1: i32) -> (i32, i32) {
    %c0_i32 = arith.constant 0 : i32
    %c0_i32_0 = arith.constant 0 : i32
    %c0_i32_1 = arith.constant 0 : i32
    return %c0_i32, %c0_i32_0 : i32, i32
  }
  func.func @transform_2(%arg0: i32, %arg1: i32) -> (i32, i32) {
    %c0_i32 = arith.constant 0 : i32
    %c0_i32_0 = arith.constant 0 : i32
    %c0_i32_1 = arith.constant 0 : i32
    return %c0_i32, %c0_i32_0 : i32, i32
  }
  func.func @transform_3(%arg0: i32, %arg1: i32) -> (i32, i32) {
    %c0_i32 = arith.constant 0 : i32
    %c0_i32_0 = arith.constant 0 : i32
    %c0_i32_1 = arith.constant 0 : i32
    return %c0_i32, %c0_i32_0 : i32, i32
  }
  func.func @transform_4(%arg0: i32, %arg1: i32) -> (i32, i32) {
    %c0_i32 = arith.constant 0 : i32
    %c0_i32_0 = arith.constant 0 : i32
    %c0_i32_1 = arith.constant 0 : i32
    return %c0_i32, %c0_i32_0 : i32, i32
  }
  func.func @transform_5(%arg0: i32, %arg1: i32) -> (i32, i32) {
    %c0_i32 = arith.constant 0 : i32
    %c0_i32_0 = arith.constant 0 : i32
    %c0_i32_1 = arith.constant 0 : i32
    return %c0_i32, %c0_i32_0 : i32, i32
  }
  func.func @transform_6(%arg0: i32, %arg1: i32) -> (i32, i32) {
    %c0_i32 = arith.constant 0 : i32
    %c0_i32_0 = arith.constant 0 : i32
    %c0_i32_1 = arith.constant 0 : i32
    return %c0_i32, %c0_i32_0 : i32, i32
  }
  func.func @transform_7(%arg0: i32, %arg1: i32) -> (i32, i32) {
    %c0_i32 = arith.constant 0 : i32
    %c0_i32_0 = arith.constant 0 : i32
    %c0_i32_1 = arith.constant 0 : i32
    return %c0_i32, %c0_i32_0 : i32, i32
  }
  func.func @transform_8(%arg0: i32, %arg1: i32) -> (i32, i32) {
    %c0_i32 = arith.constant 0 : i32
    %c0_i32_0 = arith.constant 0 : i32
    %c0_i32_1 = arith.constant 0 : i32
    return %c0_i32, %c0_i32_0 : i32, i32
  }
  func.func @transform_9(%arg0: i32, %arg1: i32) -> (i32, i32) {
    %c0_i32 = arith.constant 0 : i32
    %c0_i32_0 = arith.constant 0 : i32
    %c0_i32_1 = arith.constant 0 : i32
    return %c0_i32, %c0_i32_0 : i32, i32
  }
  func.func @transform_10(%arg0: i32, %arg1: i32) -> (i32, i32) {
    %c0_i32 = arith.constant 0 : i32
    %c0_i32_0 = arith.constant 0 : i32
    %c0_i32_1 = arith.constant 0 : i32
    return %c0_i32, %c0_i32_0 : i32, i32
  }
  func.func @transform_11(%arg0: i32, %arg1: i32) -> (i32, i32) {
    %c0_i32 = arith.constant 0 : i32
    %c0_i32_0 = arith.constant 0 : i32
    %c0_i32_1 = arith.constant 0 : i32
    return %c0_i32, %c0_i32_0 : i32, i32
  }
  func.func @transform_12(%arg0: i32, %arg1: i32) -> (i32, i32) {
    %c0_i32 = arith.constant 0 : i32
    %c0_i32_0 = arith.constant 0 : i32
    %c0_i32_1 = arith.constant 0 : i32
    return %c0_i32, %c0_i32_0 : i32, i32
  }
  func.func @transform_13(%arg0: i32, %arg1: i32) -> (i32, i32) {
    %c0_i32 = arith.constant 0 : i32
    %c0_i32_0 = arith.constant 0 : i32
    %c0_i32_1 = arith.constant 0 : i32
    return %c0_i32, %c0_i32_0 : i32, i32
  }
  func.func @transform_14(%arg0: i32, %arg1: i32) -> (i32, i32) {
    %c0_i32 = arith.constant 0 : i32
    %c0_i32_0 = arith.constant 0 : i32
    %c0_i32_1 = arith.constant 0 : i32
    return %c0_i32, %c0_i32_0 : i32, i32
  }
  func.func @transform_15(%arg0: i32, %arg1: i32) -> (i32, i32, i32) {
    %c0_i32 = arith.constant 0 : i32
    %c0_i32_0 = arith.constant 0 : i32
    return %arg0, %arg1, %c0_i32 : i32, i32, i32
  }
}

module attributes {stable_mosaic.version = 11 : i64} {
  func.func @kernel(%arg0: i32, %arg1: i32, %arg2: memref<1x8x32xf32, #tpu.memory_space<vmem>>, %arg3: memref<1x32xf32, #tpu.memory_space<vmem>>, %arg4: memref<1x32xf32, #tpu.memory_space<vmem>>, %arg5: memref<32x32xbf16, #tpu.memory_space<vmem>>, %arg6: memref<1x32xf32, #tpu.memory_space<vmem>>, %arg7: memref<32x64xbf16, #tpu.memory_space<vmem>>, %arg8: memref<1x64xf32, #tpu.memory_space<vmem>>, %arg9: memref<32x32xbf16, #tpu.memory_space<vmem>>, %arg10: memref<1x32xf32, #tpu.memory_space<vmem>>, %arg11: memref<1x32xf32, #tpu.memory_space<vmem>>, %arg12: memref<1x32xf32, #tpu.memory_space<vmem>>, %arg13: memref<32x128xbf16, #tpu.memory_space<vmem>>, %arg14: memref<1x128xf32, #tpu.memory_space<vmem>>, %arg15: memref<128x32xbf16, #tpu.memory_space<vmem>>, %arg16: memref<1x32xf32, #tpu.memory_space<vmem>>, %arg17: memref<1x8x32xf32, #tpu.memory_space<vmem>>, %arg18: memref<8x32xbf16, #tpu.memory_space<vmem>>, %arg19: memref<8x64xbf16, #tpu.memory_space<vmem>>, %arg20: memref<8x32xbf16, #tpu.memory_space<vmem>>) attributes {dimension_semantics = [#tpu.dimension_semantics<parallel>, #tpu.dimension_semantics<parallel>], iteration_bounds = array<i64: 2, 1>, scalar_prefetch = 0 : i64, scratch_operands = 3 : i64, tpu.core_type = #tpu.core_type<tc>, window_params = [{transform_indices = @transform_0, window_bounds = array<i64: 1, 8, 32>}, {pipeline_mode = #tpu.pipeline_mode<synchronous>, transform_indices = @transform_1, window_bounds = array<i64: 1, 32>}, {pipeline_mode = #tpu.pipeline_mode<synchronous>, transform_indices = @transform_2, window_bounds = array<i64: 1, 32>}, {pipeline_mode = #tpu.pipeline_mode<synchronous>, transform_indices = @transform_3, window_bounds = array<i64: 32, 32>}, {pipeline_mode = #tpu.pipeline_mode<synchronous>, transform_indices = @transform_4, window_bounds = array<i64: 1, 32>}, {pipeline_mode = #tpu.pipeline_mode<synchronous>, transform_indices = @transform_5, window_bounds = array<i64: 32, 64>}, {pipeline_mode = #tpu.pipeline_mode<synchronous>, transform_indices = @transform_6, window_bounds = array<i64: 1, 64>}, {pipeline_mode = #tpu.pipeline_mode<synchronous>, transform_indices = @transform_7, window_bounds = array<i64: 32, 32>}, {pipeline_mode = #tpu.pipeline_mode<synchronous>, transform_indices = @transform_8, window_bounds = array<i64: 1, 32>}, {pipeline_mode = #tpu.pipeline_mode<synchronous>, transform_indices = @transform_9, window_bounds = array<i64: 1, 32>}, {pipeline_mode = #tpu.pipeline_mode<synchronous>, transform_indices = @transform_10, window_bounds = array<i64: 1, 32>}, {pipeline_mode = #tpu.pipeline_mode<synchronous>, transform_indices = @transform_11, window_bounds = array<i64: 32, 128>}, {pipeline_mode = #tpu.pipeline_mode<synchronous>, transform_indices = @transform_12, window_bounds = array<i64: 1, 128>}, {pipeline_mode = #tpu.pipeline_mode<synchronous>, transform_indices = @transform_13, window_bounds = array<i64: 128, 32>}, {pipeline_mode = #tpu.pipeline_mode<synchronous>, transform_indices = @transform_14, window_bounds = array<i64: 1, 32>}, {transform_indices = @transform_15, window_bounds = array<i64: 1, 8, 32>}]} {
    %c0 = arith.constant 0 : index
    %c0_0 = arith.constant 0 : index
    %c0_1 = arith.constant 0 : index
    %0 = vector.load %arg2[%c0, %c0_0, %c0_1] : memref<1x8x32xf32, #tpu.memory_space<vmem>>, vector<1x8x32xf32>
    %1 = vector.shape_cast %0 : vector<1x8x32xf32> to vector<8x32xf32>
    %cst = arith.constant dense<0.000000e+00> : vector<8xf32>
    %2 = vector.multi_reduction <add>, %1, %cst [1] : vector<8x32xf32> to vector<8xf32>
    %3 = vector.shape_cast %2 : vector<8xf32> to vector<8x1xf32>
    %cst_2 = arith.constant 3.200000e+01 : f32
    %4 = vector.broadcast %cst_2 : f32 to vector<8x1xf32>
    %5 = arith.divf %3, %4 : vector<8x1xf32>
    %6 = vector.broadcast %5 : vector<8x1xf32> to vector<8x32xf32>
    %7 = arith.subf %1, %6 : vector<8x32xf32>
    %8 = arith.mulf %7, %7 : vector<8x32xf32>
    %cst_3 = arith.constant dense<0.000000e+00> : vector<8xf32>
    %9 = vector.multi_reduction <add>, %8, %cst_3 [1] : vector<8x32xf32> to vector<8xf32>
    %10 = vector.shape_cast %9 : vector<8xf32> to vector<8x1xf32>
    %cst_4 = arith.constant 3.200000e+01 : f32
    %11 = vector.broadcast %cst_4 : f32 to vector<8x1xf32>
    %12 = arith.divf %10, %11 : vector<8x1xf32>
    %13 = vector.broadcast %5 : vector<8x1xf32> to vector<8x32xf32>
    %14 = arith.subf %1, %13 : vector<8x32xf32>
    %cst_5 = arith.constant 9.99999974E-6 : f32
    %15 = vector.broadcast %cst_5 : f32 to vector<8x1xf32>
    %16 = arith.addf %12, %15 : vector<8x1xf32>
    %17 = math.rsqrt %16 : vector<8x1xf32>
    %18 = vector.broadcast %17 : vector<8x1xf32> to vector<8x32xf32>
    %19 = arith.mulf %14, %18 : vector<8x32xf32>
    %c0_6 = arith.constant 0 : index
    %c0_7 = arith.constant 0 : index
    %20 = vector.load %arg3[%c0_6, %c0_7] : memref<1x32xf32, #tpu.memory_space<vmem>>, vector<1x32xf32>
    %21 = vector.broadcast %20 : vector<1x32xf32> to vector<8x32xf32>
    %22 = arith.mulf %19, %21 : vector<8x32xf32>
    %c0_8 = arith.constant 0 : index
    %c0_9 = arith.constant 0 : index
    %23 = vector.load %arg4[%c0_8, %c0_9] : memref<1x32xf32, #tpu.memory_space<vmem>>, vector<1x32xf32>
    %24 = vector.broadcast %23 : vector<1x32xf32> to vector<8x32xf32>
    %25 = arith.addf %22, %24 : vector<8x32xf32>
    %26 = arith.truncf %25 : vector<8x32xf32> to vector<8x32xbf16>
    %c0_10 = arith.constant 0 : index
    %c0_11 = arith.constant 0 : index
    %27 = vector.load %arg7[%c0_10, %c0_11] : memref<32x64xbf16, #tpu.memory_space<vmem>>, vector<32x64xbf16>
    %cst_12 = arith.constant dense<0.000000e+00> : vector<8x64xf32>
    %28 = tpu.matmul %26, %27, %cst_12 {dimension_numbers = #tpu.dot_dimension_numbers<[1], [0], [0], [1], [0, 0, 1, 1], [], []>} : vector<8x32xbf16>, vector<32x64xbf16>, vector<8x64xf32> -> vector<8x64xf32>
    %c0_13 = arith.constant 0 : index
    %c0_14 = arith.constant 0 : index
    %29 = vector.load %arg8[%c0_13, %c0_14] : memref<1x64xf32, #tpu.memory_space<vmem>>, vector<1x64xf32>
    %30 = vector.broadcast %29 : vector<1x64xf32> to vector<8x64xf32>
    %31 = arith.addf %28, %30 : vector<8x64xf32>
    %32 = arith.truncf %31 : vector<8x64xf32> to vector<8x64xbf16>
    %c0_15 = arith.constant 0 : index
    %c0_16 = arith.constant 0 : index
    %33 = vector.load %arg19[%c0_15, %c0_16] : memref<8x64xbf16, #tpu.memory_space<vmem>>, vector<8x64xbf16>
    tpu.vector_store %arg19[%c0_15, %c0_16], %32 {strides = array<i32>} : memref<8x64xbf16, #tpu.memory_space<vmem>>, vector<8x64xbf16>,
    %34 = arith.truncf %25 : vector<8x32xf32> to vector<8x32xbf16>
    %c0_17 = arith.constant 0 : index
    %c0_18 = arith.constant 0 : index
    %35 = vector.load %arg5[%c0_17, %c0_18] : memref<32x32xbf16, #tpu.memory_space<vmem>>, vector<32x32xbf16>
    %cst_19 = arith.constant dense<0.000000e+00> : vector<8x32xf32>
    %36 = tpu.matmul %34, %35, %cst_19 {dimension_numbers = #tpu.dot_dimension_numbers<[1], [0], [0], [1], [0, 0, 1, 1], [], []>} : vector<8x32xbf16>, vector<32x32xbf16>, vector<8x32xf32> -> vector<8x32xf32>
    %c0_20 = arith.constant 0 : index
    %c0_21 = arith.constant 0 : index
    %37 = vector.load %arg6[%c0_20, %c0_21] : memref<1x32xf32, #tpu.memory_space<vmem>>, vector<1x32xf32>
    %38 = vector.broadcast %37 : vector<1x32xf32> to vector<8x32xf32>
    %39 = arith.addf %36, %38 : vector<8x32xf32>
    %40 = arith.truncf %39 : vector<8x32xf32> to vector<8x32xbf16>
    %c0_22 = arith.constant 0 : index
    %c0_23 = arith.constant 0 : index
    %41 = vector.load %arg18[%c0_22, %c0_23] : memref<8x32xbf16, #tpu.memory_space<vmem>>, vector<8x32xbf16>
    tpu.vector_store %arg18[%c0_22, %c0_23], %40 {strides = array<i32>} : memref<8x32xbf16, #tpu.memory_space<vmem>>, vector<8x32xbf16>,
    %c0_24 = arith.constant 0 : index
    %c0_25 = arith.constant 0 : index
    %42 = vector.load %arg18[%c0_24, %c0_25] : memref<8x32xbf16, #tpu.memory_space<vmem>>, vector<8x32xbf16>
    %c0_26 = arith.constant 0 : index
    %c0_27 = arith.constant 0 : index
    %43 = vector.load %arg19[%c0_26, %c0_27] : memref<8x64xbf16, #tpu.memory_space<vmem>>, vector<8x32xbf16>
    %c0_28 = arith.constant 0 : index
    %c32 = arith.constant 32 : index
    %44 = vector.load %arg19[%c0_28, %c32] : memref<8x64xbf16, #tpu.memory_space<vmem>>, vector<8x32xbf16>
    %45 = vector.extract_strided_slice %42 {offsets = [0, 0], sizes = [8, 8], strides = [1, 1]} : vector<8x32xbf16> to vector<8x8xbf16>
    %46 = vector.extract_strided_slice %43 {offsets = [0, 0], sizes = [8, 8], strides = [1, 1]} : vector<8x32xbf16> to vector<8x8xbf16>
    %47 = vector.extract_strided_slice %44 {offsets = [0, 0], sizes = [8, 8], strides = [1, 1]} : vector<8x32xbf16> to vector<8x8xbf16>
    %cst_29 = arith.constant dense<0.000000e+00> : vector<8x8xf32>
    %48 = tpu.matmul %45, %46, %cst_29 {dimension_numbers = #tpu.dot_dimension_numbers<[1], [1], [0], [0], [0, 0, 1, 0], [], []>} : vector<8x8xbf16>, vector<8x8xbf16>, vector<8x8xf32> -> vector<8x8xf32>
    %cst_30 = arith.constant dense<0xFF800000> : vector<8xf32>
    %49 = vector.multi_reduction <maximumf>, %48, %cst_30 [1] : vector<8x8xf32> to vector<8xf32>
    %50 = vector.shape_cast %49 : vector<8xf32> to vector<8x1xf32>
    %51 = vector.broadcast %50 : vector<8x1xf32> to vector<8x8xf32>
    %52 = arith.subf %48, %51 : vector<8x8xf32>
    %53 = math.exp %52 : vector<8x8xf32>
    %cst_31 = arith.constant dense<0.000000e+00> : vector<8xf32>
    %54 = vector.multi_reduction <add>, %53, %cst_31 [1] : vector<8x8xf32> to vector<8xf32>
    %55 = vector.shape_cast %54 : vector<8xf32> to vector<8x1xf32>
    %56 = tpu.reciprocal %55 {approx = true} : vector<8x1xf32> -> vector<8x1xf32>
    %57 = vector.broadcast %56 : vector<8x1xf32> to vector<8x8xf32>
    %58 = arith.mulf %53, %57 : vector<8x8xf32>
    %59 = arith.truncf %58 : vector<8x8xf32> to vector<8x8xbf16>
    %cst_32 = arith.constant dense<0.000000e+00> : vector<8x8xf32>
    %60 = tpu.matmul %59, %47, %cst_32 {dimension_numbers = #tpu.dot_dimension_numbers<[1], [0], [0], [1], [0, 0, 1, 1], [], []>} : vector<8x8xbf16>, vector<8x8xbf16>, vector<8x8xf32> -> vector<8x8xf32>
    %61 = vector.extract_strided_slice %42 {offsets = [0, 8], sizes = [8, 8], strides = [1, 1]} : vector<8x32xbf16> to vector<8x8xbf16>
    %62 = vector.extract_strided_slice %43 {offsets = [0, 8], sizes = [8, 8], strides = [1, 1]} : vector<8x32xbf16> to vector<8x8xbf16>
    %63 = vector.extract_strided_slice %44 {offsets = [0, 8], sizes = [8, 8], strides = [1, 1]} : vector<8x32xbf16> to vector<8x8xbf16>
    %cst_33 = arith.constant dense<0.000000e+00> : vector<8x8xf32>
    %64 = tpu.matmul %61, %62, %cst_33 {dimension_numbers = #tpu.dot_dimension_numbers<[1], [1], [0], [0], [0, 0, 1, 0], [], []>} : vector<8x8xbf16>, vector<8x8xbf16>, vector<8x8xf32> -> vector<8x8xf32>
    %cst_34 = arith.constant dense<0xFF800000> : vector<8xf32>
    %65 = vector.multi_reduction <maximumf>, %64, %cst_34 [1] : vector<8x8xf32> to vector<8xf32>
    %66 = vector.shape_cast %65 : vector<8xf32> to vector<8x1xf32>
    %67 = vector.broadcast %66 : vector<8x1xf32> to vector<8x8xf32>
    %68 = arith.subf %64, %67 : vector<8x8xf32>
    %69 = math.exp %68 : vector<8x8xf32>
    %cst_35 = arith.constant dense<0.000000e+00> : vector<8xf32>
    %70 = vector.multi_reduction <add>, %69, %cst_35 [1] : vector<8x8xf32> to vector<8xf32>
    %71 = vector.shape_cast %70 : vector<8xf32> to vector<8x1xf32>
    %72 = tpu.reciprocal %71 {approx = true} : vector<8x1xf32> -> vector<8x1xf32>
    %73 = vector.broadcast %72 : vector<8x1xf32> to vector<8x8xf32>
    %74 = arith.mulf %69, %73 : vector<8x8xf32>
    %75 = arith.truncf %74 : vector<8x8xf32> to vector<8x8xbf16>
    %cst_36 = arith.constant dense<0.000000e+00> : vector<8x8xf32>
    %76 = tpu.matmul %75, %63, %cst_36 {dimension_numbers = #tpu.dot_dimension_numbers<[1], [0], [0], [1], [0, 0, 1, 1], [], []>} : vector<8x8xbf16>, vector<8x8xbf16>, vector<8x8xf32> -> vector<8x8xf32>
    %77 = vector.extract_strided_slice %42 {offsets = [0, 16], sizes = [8, 8], strides = [1, 1]} : vector<8x32xbf16> to vector<8x8xbf16>
    %78 = vector.extract_strided_slice %43 {offsets = [0, 16], sizes = [8, 8], strides = [1, 1]} : vector<8x32xbf16> to vector<8x8xbf16>
    %79 = vector.extract_strided_slice %44 {offsets = [0, 16], sizes = [8, 8], strides = [1, 1]} : vector<8x32xbf16> to vector<8x8xbf16>
    %cst_37 = arith.constant dense<0.000000e+00> : vector<8x8xf32>
    %80 = tpu.matmul %77, %78, %cst_37 {dimension_numbers = #tpu.dot_dimension_numbers<[1], [1], [0], [0], [0, 0, 1, 0], [], []>} : vector<8x8xbf16>, vector<8x8xbf16>, vector<8x8xf32> -> vector<8x8xf32>
    %cst_38 = arith.constant dense<0xFF800000> : vector<8xf32>
    %81 = vector.multi_reduction <maximumf>, %80, %cst_38 [1] : vector<8x8xf32> to vector<8xf32>
    %82 = vector.shape_cast %81 : vector<8xf32> to vector<8x1xf32>
    %83 = vector.broadcast %82 : vector<8x1xf32> to vector<8x8xf32>
    %84 = arith.subf %80, %83 : vector<8x8xf32>
    %85 = math.exp %84 : vector<8x8xf32>
    %cst_39 = arith.constant dense<0.000000e+00> : vector<8xf32>
    %86 = vector.multi_reduction <add>, %85, %cst_39 [1] : vector<8x8xf32> to vector<8xf32>
    %87 = vector.shape_cast %86 : vector<8xf32> to vector<8x1xf32>
    %88 = tpu.reciprocal %87 {approx = true} : vector<8x1xf32> -> vector<8x1xf32>
    %89 = vector.broadcast %88 : vector<8x1xf32> to vector<8x8xf32>
    %90 = arith.mulf %85, %89 : vector<8x8xf32>
    %91 = arith.truncf %90 : vector<8x8xf32> to vector<8x8xbf16>
    %cst_40 = arith.constant dense<0.000000e+00> : vector<8x8xf32>
    %92 = tpu.matmul %91, %79, %cst_40 {dimension_numbers = #tpu.dot_dimension_numbers<[1], [0], [0], [1], [0, 0, 1, 1], [], []>} : vector<8x8xbf16>, vector<8x8xbf16>, vector<8x8xf32> -> vector<8x8xf32>
    %93 = vector.extract_strided_slice %42 {offsets = [0, 24], sizes = [8, 8], strides = [1, 1]} : vector<8x32xbf16> to vector<8x8xbf16>
    %94 = vector.extract_strided_slice %43 {offsets = [0, 24], sizes = [8, 8], strides = [1, 1]} : vector<8x32xbf16> to vector<8x8xbf16>
    %95 = vector.extract_strided_slice %44 {offsets = [0, 24], sizes = [8, 8], strides = [1, 1]} : vector<8x32xbf16> to vector<8x8xbf16>
    %cst_41 = arith.constant dense<0.000000e+00> : vector<8x8xf32>
    %96 = tpu.matmul %93, %94, %cst_41 {dimension_numbers = #tpu.dot_dimension_numbers<[1], [1], [0], [0], [0, 0, 1, 0], [], []>} : vector<8x8xbf16>, vector<8x8xbf16>, vector<8x8xf32> -> vector<8x8xf32>
    %cst_42 = arith.constant dense<0xFF800000> : vector<8xf32>
    %97 = vector.multi_reduction <maximumf>, %96, %cst_42 [1] : vector<8x8xf32> to vector<8xf32>
    %98 = vector.shape_cast %97 : vector<8xf32> to vector<8x1xf32>
    %99 = vector.broadcast %98 : vector<8x1xf32> to vector<8x8xf32>
    %100 = arith.subf %96, %99 : vector<8x8xf32>
    %101 = math.exp %100 : vector<8x8xf32>
    %cst_43 = arith.constant dense<0.000000e+00> : vector<8xf32>
    %102 = vector.multi_reduction <add>, %101, %cst_43 [1] : vector<8x8xf32> to vector<8xf32>
    %103 = vector.shape_cast %102 : vector<8xf32> to vector<8x1xf32>
    %104 = tpu.reciprocal %103 {approx = true} : vector<8x1xf32> -> vector<8x1xf32>
    %105 = vector.broadcast %104 : vector<8x1xf32> to vector<8x8xf32>
    %106 = arith.mulf %101, %105 : vector<8x8xf32>
    %107 = arith.truncf %106 : vector<8x8xf32> to vector<8x8xbf16>
    %cst_44 = arith.constant dense<0.000000e+00> : vector<8x8xf32>
    %108 = tpu.matmul %107, %95, %cst_44 {dimension_numbers = #tpu.dot_dimension_numbers<[1], [0], [0], [1], [0, 0, 1, 1], [], []>} : vector<8x8xbf16>, vector<8x8xbf16>, vector<8x8xf32> -> vector<8x8xf32>
    %109 = tpu.concatenate %60, %76, %92, %108 in 1 : vector<8x8xf32>, vector<8x8xf32>, vector<8x8xf32>, vector<8x8xf32> -> vector<8x32xf32>
    %110 = arith.truncf %109 : vector<8x32xf32> to vector<8x32xbf16>
    %c0_45 = arith.constant 0 : index
    %c0_46 = arith.constant 0 : index
    %111 = vector.load %arg20[%c0_45, %c0_46] : memref<8x32xbf16, #tpu.memory_space<vmem>>, vector<8x32xbf16>
    tpu.vector_store %arg20[%c0_45, %c0_46], %110 {strides = array<i32>} : memref<8x32xbf16, #tpu.memory_space<vmem>>, vector<8x32xbf16>,
    %c0_47 = arith.constant 0 : index
    %c0_48 = arith.constant 0 : index
    %112 = vector.load %arg20[%c0_47, %c0_48] : memref<8x32xbf16, #tpu.memory_space<vmem>>, vector<8x32xbf16>
    %c0_49 = arith.constant 0 : index
    %c0_50 = arith.constant 0 : index
    %113 = vector.load %arg9[%c0_49, %c0_50] : memref<32x32xbf16, #tpu.memory_space<vmem>>, vector<32x32xbf16>
    %cst_51 = arith.constant dense<0.000000e+00> : vector<8x32xf32>
    %114 = tpu.matmul %112, %113, %cst_51 {dimension_numbers = #tpu.dot_dimension_numbers<[1], [0], [0], [1], [0, 0, 1, 1], [], []>} : vector<8x32xbf16>, vector<32x32xbf16>, vector<8x32xf32> -> vector<8x32xf32>
    %c0_52 = arith.constant 0 : index
    %c0_53 = arith.constant 0 : index
    %115 = vector.load %arg10[%c0_52, %c0_53] : memref<1x32xf32, #tpu.memory_space<vmem>>, vector<1x32xf32>
    %116 = vector.broadcast %115 : vector<1x32xf32> to vector<8x32xf32>
    %117 = arith.addf %114, %116 : vector<8x32xf32>
    %118 = arith.addf %1, %117 : vector<8x32xf32>
    %cst_54 = arith.constant dense<0.000000e+00> : vector<8xf32>
    %119 = vector.multi_reduction <add>, %118, %cst_54 [1] : vector<8x32xf32> to vector<8xf32>
    %120 = vector.shape_cast %119 : vector<8xf32> to vector<8x1xf32>
    %cst_55 = arith.constant 3.200000e+01 : f32
    %121 = vector.broadcast %cst_55 : f32 to vector<8x1xf32>
    %122 = arith.divf %120, %121 : vector<8x1xf32>
    %123 = vector.broadcast %122 : vector<8x1xf32> to vector<8x32xf32>
    %124 = arith.subf %118, %123 : vector<8x32xf32>
    %125 = arith.mulf %124, %124 : vector<8x32xf32>
    %cst_56 = arith.constant dense<0.000000e+00> : vector<8xf32>
    %126 = vector.multi_reduction <add>, %125, %cst_56 [1] : vector<8x32xf32> to vector<8xf32>
    %127 = vector.shape_cast %126 : vector<8xf32> to vector<8x1xf32>
    %cst_57 = arith.constant 3.200000e+01 : f32
    %128 = vector.broadcast %cst_57 : f32 to vector<8x1xf32>
    %129 = arith.divf %127, %128 : vector<8x1xf32>
    %130 = vector.broadcast %122 : vector<8x1xf32> to vector<8x32xf32>
    %131 = arith.subf %118, %130 : vector<8x32xf32>
    %cst_58 = arith.constant 9.99999974E-6 : f32
    %132 = vector.broadcast %cst_58 : f32 to vector<8x1xf32>
    %133 = arith.addf %129, %132 : vector<8x1xf32>
    %134 = math.rsqrt %133 : vector<8x1xf32>
    %135 = vector.broadcast %134 : vector<8x1xf32> to vector<8x32xf32>
    %136 = arith.mulf %131, %135 : vector<8x32xf32>
    %c0_59 = arith.constant 0 : index
    %c0_60 = arith.constant 0 : index
    %137 = vector.load %arg11[%c0_59, %c0_60] : memref<1x32xf32, #tpu.memory_space<vmem>>, vector<1x32xf32>
    %138 = vector.broadcast %137 : vector<1x32xf32> to vector<8x32xf32>
    %139 = arith.mulf %136, %138 : vector<8x32xf32>
    %c0_61 = arith.constant 0 : index
    %c0_62 = arith.constant 0 : index
    %140 = vector.load %arg12[%c0_61, %c0_62] : memref<1x32xf32, #tpu.memory_space<vmem>>, vector<1x32xf32>
    %141 = vector.broadcast %140 : vector<1x32xf32> to vector<8x32xf32>
    %142 = arith.addf %139, %141 : vector<8x32xf32>
    %143 = arith.truncf %142 : vector<8x32xf32> to vector<8x32xbf16>
    %c0_63 = arith.constant 0 : index
    %c0_64 = arith.constant 0 : index
    %144 = vector.load %arg13[%c0_63, %c0_64] : memref<32x128xbf16, #tpu.memory_space<vmem>>, vector<32x128xbf16>
    %cst_65 = arith.constant dense<0.000000e+00> : vector<8x128xf32>
    %145 = tpu.matmul %143, %144, %cst_65 {dimension_numbers = #tpu.dot_dimension_numbers<[1], [0], [0], [1], [0, 0, 1, 1], [], []>} : vector<8x32xbf16>, vector<32x128xbf16>, vector<8x128xf32> -> vector<8x128xf32>
    %c0_66 = arith.constant 0 : index
    %c0_67 = arith.constant 0 : index
    %146 = vector.load %arg14[%c0_66, %c0_67] : memref<1x128xf32, #tpu.memory_space<vmem>>, vector<1x128xf32>
    %147 = vector.broadcast %146 : vector<1x128xf32> to vector<8x128xf32>
    %148 = arith.addf %145, %147 : vector<8x128xf32>
    %149 = arith.truncf %148 : vector<8x128xf32> to vector<8x128xbf16>
    %cst_68 = arith.constant 1.703130e+00 : bf16
    %150 = vector.broadcast %cst_68 : bf16 to vector<8x128xbf16>
    %151 = arith.mulf %150, %149 : vector<8x128xbf16>
    %152 = arith.negf %151 : vector<8x128xbf16>
    %153 = math.exp %152 : vector<8x128xbf16>
    %cst_69 = arith.constant 1.000000e+00 : bf16
    %154 = vector.broadcast %cst_69 : bf16 to vector<8x128xbf16>
    %155 = arith.addf %154, %153 : vector<8x128xbf16>
    %156 = arith.divf %154, %155 : vector<8x128xbf16>
    %157 = arith.mulf %149, %156 : vector<8x128xbf16>
    %c0_70 = arith.constant 0 : index
    %c0_71 = arith.constant 0 : index
    %158 = vector.load %arg15[%c0_70, %c0_71] : memref<128x32xbf16, #tpu.memory_space<vmem>>, vector<128x32xbf16>
    %cst_72 = arith.constant dense<0.000000e+00> : vector<8x32xf32>
    %159 = tpu.matmul %157, %158, %cst_72 {dimension_numbers = #tpu.dot_dimension_numbers<[1], [0], [0], [1], [0, 0, 1, 1], [], []>} : vector<8x128xbf16>, vector<128x32xbf16>, vector<8x32xf32> -> vector<8x32xf32>
    %c0_73 = arith.constant 0 : index
    %c0_74 = arith.constant 0 : index
    %160 = vector.load %arg16[%c0_73, %c0_74] : memref<1x32xf32, #tpu.memory_space<vmem>>, vector<1x32xf32>
    %161 = vector.broadcast %160 : vector<1x32xf32> to vector<8x32xf32>
    %162 = arith.addf %159, %161 : vector<8x32xf32>
    %163 = arith.addf %118, %162 : vector<8x32xf32>
    %c0_75 = arith.constant 0 : index
    %c0_76 = arith.constant 0 : index
    %c0_77 = arith.constant 0 : index
    %164 = vector.load %arg17[%c0_75, %c0_76, %c0_77] : memref<1x8x32xf32, #tpu.memory_space<vmem>>, vector<1x8x32xf32>
    %165 = vector.shape_cast %164 : vector<1x8x32xf32> to vector<8x32xf32>
    %166 = vector.shape_cast %163 : vector<8x32xf32> to vector<1x8x32xf32>
    tpu.vector_store %arg17[%c0_75, %c0_76, %c0_77], %166 {strides = array<i32>} : memref<1x8x32xf32, #tpu.memory_space<vmem>>, vector<1x8x32xf32>,
    return
  }
  func.func @transform_0(%arg0: i32, %arg1: i32) -> (i32, i32, i32) {
    %c0_i32 = arith.constant 0 : i32
    %c0_i32_0 = arith.constant 0 : i32
    %c0_i32_1 = arith.constant 0 : i32
    return %arg0, %c0_i32, %c0_i32_0 : i32, i32, i32
  }
  func.func @transform_1(%arg0: i32, %arg1: i32) -> (i32, i32) {
    %c0_i32 = arith.constant 0 : i32
    %c0_i32_0 = arith.constant 0 : i32
    %c0_i32_1 = arith.constant 0 : i32
    return %c0_i32, %c0_i32_0 : i32, i32
  }
  func.func @transform_2(%arg0: i32, %arg1: i32) -> (i32, i32) {
    %c0_i32 = arith.constant 0 : i32
    %c0_i32_0 = arith.constant 0 : i32
    %c0_i32_1 = arith.constant 0 : i32
    return %c0_i32, %c0_i32_0 : i32, i32
  }
  func.func @transform_3(%arg0: i32, %arg1: i32) -> (i32, i32) {
    %c0_i32 = arith.constant 0 : i32
    %c0_i32_0 = arith.constant 0 : i32
    %c0_i32_1 = arith.constant 0 : i32
    return %c0_i32, %c0_i32_0 : i32, i32
  }
  func.func @transform_4(%arg0: i32, %arg1: i32) -> (i32, i32) {
    %c0_i32 = arith.constant 0 : i32
    %c0_i32_0 = arith.constant 0 : i32
    %c0_i32_1 = arith.constant 0 : i32
    return %c0_i32, %c0_i32_0 : i32, i32
  }
  func.func @transform_5(%arg0: i32, %arg1: i32) -> (i32, i32) {
    %c0_i32 = arith.constant 0 : i32
    %c0_i32_0 = arith.constant 0 : i32
    %c0_i32_1 = arith.constant 0 : i32
    return %c0_i32, %c0_i32_0 : i32, i32
  }
  func.func @transform_6(%arg0: i32, %arg1: i32) -> (i32, i32) {
    %c0_i32 = arith.constant 0 : i32
    %c0_i32_0 = arith.constant 0 : i32
    %c0_i32_1 = arith.constant 0 : i32
    return %c0_i32, %c0_i32_0 : i32, i32
  }
  func.func @transform_7(%arg0: i32, %arg1: i32) -> (i32, i32) {
    %c0_i32 = arith.constant 0 : i32
    %c0_i32_0 = arith.constant 0 : i32
    %c0_i32_1 = arith.constant 0 : i32
    return %c0_i32, %c0_i32_0 : i32, i32
  }
  func.func @transform_8(%arg0: i32, %arg1: i32) -> (i32, i32) {
    %c0_i32 = arith.constant 0 : i32
    %c0_i32_0 = arith.constant 0 : i32
    %c0_i32_1 = arith.constant 0 : i32
    return %c0_i32, %c0_i32_0 : i32, i32
  }
  func.func @transform_9(%arg0: i32, %arg1: i32) -> (i32, i32) {
    %c0_i32 = arith.constant 0 : i32
    %c0_i32_0 = arith.constant 0 : i32
    %c0_i32_1 = arith.constant 0 : i32
    return %c0_i32, %c0_i32_0 : i32, i32
  }
  func.func @transform_10(%arg0: i32, %arg1: i32) -> (i32, i32) {
    %c0_i32 = arith.constant 0 : i32
    %c0_i32_0 = arith.constant 0 : i32
    %c0_i32_1 = arith.constant 0 : i32
    return %c0_i32, %c0_i32_0 : i32, i32
  }
  func.func @transform_11(%arg0: i32, %arg1: i32) -> (i32, i32) {
    %c0_i32 = arith.constant 0 : i32
    %c0_i32_0 = arith.constant 0 : i32
    %c0_i32_1 = arith.constant 0 : i32
    return %c0_i32, %c0_i32_0 : i32, i32
  }
  func.func @transform_12(%arg0: i32, %arg1: i32) -> (i32, i32) {
    %c0_i32 = arith.constant 0 : i32
    %c0_i32_0 = arith.constant 0 : i32
    %c0_i32_1 = arith.constant 0 : i32
    return %c0_i32, %c0_i32_0 : i32, i32
  }
  func.func @transform_13(%arg0: i32, %arg1: i32) -> (i32, i32) {
    %c0_i32 = arith.constant 0 : i32
    %c0_i32_0 = arith.constant 0 : i32
    %c0_i32_1 = arith.constant 0 : i32
    return %c0_i32, %c0_i32_0 : i32, i32
  }
  func.func @transform_14(%arg0: i32, %arg1: i32) -> (i32, i32) {
    %c0_i32 = arith.constant 0 : i32
    %c0_i32_0 = arith.constant 0 : i32
    %c0_i32_1 = arith.constant 0 : i32
    return %c0_i32, %c0_i32_0 : i32, i32
  }
  func.func @transform_15(%arg0: i32, %arg1: i32) -> (i32, i32, i32) {
    %c0_i32 = arith.constant 0 : i32
    %c0_i32_0 = arith.constant 0 : i32
    return %arg0, %arg1, %c0_i32 : i32, i32, i32
  }
}

</mosaic_0001>

<bundles_post_ra>
// kernel: tpu_custom_call.1
= control target key start
LH: loop header
LB: loop body
LE: loop exit
PB: predicated region body
PF: predicated region fallthrough
CT: control target
= control target key end

     0   :  { %s2356_s0 = inlined_call_operand.vmem [shape: f32[2,8,32], index: 0, kind: input, shape index: {}]   ;;  %s2357_s1 = inlined_call_operand.vmem [shape: f32[1,32], index: 1, kind: input, shape index: {}]   ;;  %s2358_s2 = inlined_call_operand.vmem [shape: f32[1,32], index: 2, kind: input, shape index: {}]   ;;  %s2359_s3 = inlined_call_operand.vmem [shape: bf16[32,32], index: 3, kind: input, shape index: {}]   ;;  %s2360_s4 = inlined_call_operand.vmem [shape: f32[1,32], index: 4, kind: input, shape index: {}]   ;;  %s2361_s5 = inlined_call_operand.vmem [shape: bf16[32,64], index: 5, kind: input, shape index: {}]   ;;  %s2362_s6 = inlined_call_operand.vmem [shape: f32[1,64], index: 6, kind: input, shape index: {}]   ;;  %s2363_s7 = inlined_call_operand.vmem [shape: bf16[32,32], index: 7, kind: input, shape index: {}]   ;;  %s2364_s8 = inlined_call_operand.vmem [shape: f32[1,32], index: 8, kind: input, shape index: {}]   ;;  %s2365_s9 = inlined_call_operand.vmem [shape: f32[1,32], index: 9, kind: input, shape index: {}]   ;;  %s2366_s10 = inlined_call_operand.vmem [shape: f32[1,32], index: 10, kind: input, shape index: {}]   ;;  %s2367_s11 = inlined_call_operand.vmem [shape: bf16[32,128], index: 11, kind: input, shape index: {}]   ;;  %s2368_s12 = inlined_call_operand.hbm [shape: f32[1,128], index: 12, kind: input, shape index: {}]   ;;  %s2369_s13 = inlined_call_operand.vmem [shape: bf16[128,32], index: 13, kind: input, shape index: {}]   ;;  %s2370_s14 = inlined_call_operand.vmem [shape: f32[1,32], index: 14, kind: input, shape index: {}]   ;;  %s2371_s15 = inlined_call_operand.hbm [shape: f32[2,8,32], index: 15, kind: output, shape index: {}]  }
   0x1   :  { %2376 = sst [smem:[#allocation16_spill]] %s2356_s0 }
   0x2   :  { %20 = vsyncpa [#allocation6], 0 }
   0x3   :  { %21 = vsyncpa [#allocation7], 0 }
   0x4   :  { %23 = vsyncpa [#allocation7 + $0x1], 0  ;;  %s2047_s18 = smov 0   ;;  %s2049_s19 = smov 0  }
   0x5   :  { %s2051_s20 = smov 0   ;;  %s2053_s21 = smov 0  }
   0x6   :  { %s2055_s22 = smov 0   ;;  %s2057_s23 = smov 0  }
   0x7 LB: > { %2377 = sst [smem:[#allocation11_spill]] %s1931_s18  ;;  %s1535_s24 = sadd.s32 4294967295, %s1951_s23   ;;  %s1951_s23 = sphi %s2057_s23, %s29_s23   ;;  %s1947_s22 = sphi %s2055_s22, %s2391_s22   ;;  %s1943_s21 = sphi %s2053_s21, %s2390_s21   ;;  %s1939_s20 = sphi %s2051_s20, %s2389_s20   ;;  %s1935_s19 = sphi %s2049_s19, %s2393_s19   ;;  %s1931_s18 = sphi %s2047_s18, %s2392_s18  }
   0x8   : > { %2378 = sst [smem:[#allocation12_spill]] %s1939_s20  ;;  %s1536_s25 = sadd.s32 4294967294, %s1951_s23  }
   0x9   : > { %2379 = sst [smem:[#allocation13_spill]] %s1947_s22  ;;  %s41_s26 = sadd.s32 1, %s1947_s22 }
   0xa   : > { %s370_s27 = sadd.s32 1, %s1939_s20  ;;  %p43_p0 = scmp.ge.s32.totalorder %s41_s26, 2 }
   0xb   : > { %p380_p1 = scmp.ne.s32.totalorder %s1939_s20, %s1935_s19  ;;  %p381_p2 = scmp.eq.s32.totalorder %s1535_s24, 1 }
   0xc   : > { %p386_p3 = scmp.ne.s32.totalorder %s1935_s19, %s1931_s18  ;;  %s2395_s26 = smov (%p43_p0, %s41_s26), 0 }
   0xd   : > { %2380 = sst [smem:[#allocation14_spill]] %s2395_s26  ;;  %p2087_p4 = por %p381_p2, %p380_p1 }
   0xe   : > { %p387_p5 = scmp.eq.s32.totalorder %s1536_s25, 1  ;;  %s365_s29 = ssub.s32 %s1947_s22, %s2395_s26 }
   0xf   : > { %p1537_p6 = scmp.ge.s32.totalorder %s1951_s23, 1  ;;  %p368_p7 = scmp.eq.s32.totalorder %s365_s29, 0 }
  0x10   : > { %p2094_p8 = por %p387_p5, %p386_p3  ;;  %p394_p9 = scmp.lt.s32.totalorder %s1951_s23, 3 }
  0x11   : > { %s2100_s16 = scalar_select %p368_p7, %s1939_s20, %s370_s27  }
  0x12   : > { %p2102_p10 = pnand %p1537_p6, %p394_p9  ;;  %p2106_p11 = scmp.eq.s32.totalorder %s1535_s24, 0 }
  0x13   : > { %2383 = sst [smem:[#allocation15_spill]] %s2100_s16  ;;  %s1953_s25 = smov [#allocation5]  }
  0x14   : > { %p1731_p12 = pneg %p2102_p10  ;;  %s440_s29 = sshll.u32 %s1953_s25, 4  ;;  %s441_s29 = int_to_ptr.vmem [resolvable:$true] %s440_s29 }
  0x15   : > { %s1856_s27 = scalar_lea.vmem %s441_s29, 16  ;;  %s1863_s26 = scalar_lea.vmem %s441_s29, 32 }
  0x16   : > { %p1732_p13 = pnand %p2106_p11, %p1731_p12  ;;  %p1857_p1 = scmp.ne.s32.totalorder %s441_s29, %s1856_s27 }
  0x17   : > { %p1864_p5 = scmp.lt.s32.totalorder %s441_s29, %s441_s29  ;;  %p1865_p6 = scmp.lt.s32.totalorder %s1863_s26, %s1856_s27 }
  0x18   : > { %p1847_p0 = pneg %p1732_p13 }
  0x19   : > { %p1866_p7 = por %p1865_p6, %p1864_p5 }
  0x1a   : > { %p1859_p2 = pnand %p1857_p1, %p1847_p0 }
  0x1c   : > { %p1860_p3 = pneg %p1859_p2 }
  0x1e   : > { %p1867_p9 = pnand %p1866_p7, %p1860_p3 }
  0x20   : > { %1870 = shalt.err (!%p1867_p9)
}
  0x21   : > { %1734 = dma.hbm_to_vmem [thread:$0]  (!%p1732_p13), %s2368_s12, 16, %s441_s29, [#allocation6]  }
  0x22   : > { %466 = sbr.rel (%p2102_p10) target bundleno = 2522 (0x9da), region = 80 }
  0x27   : > { %1922 = dma.done.wait (%p2106_p11), [#allocation6], 16  }
  0x28   : > { %1924 = vsyncadd (%p2106_p11), [#allocation6], 4294967280  ;;  %p513_p12 = scmp.lt.s32.totalorder %s1943_s21, 1  ;;  %s2386_s0 = sld [smem:[#allocation16_spill]]  ;;  %vm521_vm0 = vcmask 261120   ;;  %v1803_v7 = vld [vmem:[%s2361_s5 + $0x8] sm:$0xff]  }
  0x29   : > { %v1954_v8 = vmov 0.0   ;;  %vm1955_vm1 = vmmov 0   ;;  %v1804_v9 = vld [vmem:[%s2361_s5] sm:$0xff]   ;;  %v1805_v19 = vld [vmem:[%s2359_s3 + $0x8] sm:$0xff]   ;;  %vm620_vm2 = vcmask 519168   ;;  %vm686_vm3 = vcmask 257024  }
  0x2a   : > { %s514_s26 = scalar_select %p513_p12, %s1943_s21, 1  ;;  %1625 = vmatprep.subr.bf16.mxu1 %v1954_v8  ;;  %1629 = vmatprep.mubr.msk.bf16.mxu1 %vm1955_vm1, %v1954_v8  ;;  %v1544_v14 = vld [vmem:[%s2357_s1] ss:$0 sm:$0xff]  ;;  %vm690_vm4 = vcmask 64512   ;;  %vm757_vm5 = vcmask 1043456   ;;  %vm1147_vm6 = vcmask 130048  }
  0x2b   : > { %1626 = vmatpush3.bf16.msra.mxu1 %v1803_v7  ;;  %1653 = vmatprep.subr.bf16.mxu0 %v1954_v8  ;;  %v1545_v16 = vld [vmem:[%s2358_s2] ss:$0 sm:$0xff]  ;;  %s1956_s24 = smov 112   ;;  %s1959_s27 = smov 88   ;;  %vm1149_vm7 = vcmask 195584  }
  0x2c   : > { %s1543_s25 = sshll.u32 %s514_s26, 3  ;;  %1627 = vmatprep.subr.bf16.mxu1 %v1954_v8  ;;  %1655 = vmatprep.mubr.msk.bf16.mxu0 %vm1955_vm1, %v1954_v8  ;;  %v1806_v21 = vld [vmem:[%s2359_s3] sm:$0xff]   ;;  %s1957_s26 = smov 120  }
  0x2d   : > { %v1546_v22 = vld [vmem:[%s2362_s6] ss:$0 sm:$0xff]  ;;  %s1960_s18 = smov 96   ;;  %s1961_s22 = smov 72  }
  0x2e   : > { %s516_s20 = scalar_lea.vmem %s2386_s0, %s1543_s25  ;;  %v1550_v29 = vld [vmem:[%s2360_s4] ss:$0 sm:$0xff]  ;;  %s1958_s25 = smov 104  }
  0x2f   : > { %v2128_v0 = vld [vmem:[%s516_s20] sm:$0xff]  ;;  %1628 = vmatpush3.bf16.msra.mxu1 %v1804_v9  ;;  %s1962_s20 = smov 80   ;;  %s1963_s16 = smov 8  }
  0x30   : > { %v522_v1 = vsel %vm521_vm0, %v2128_v0, 0.0  ;;  %1633 = vmatprep.subr.bf16.mxu1 %v1954_v8 }
  0x31   : > { %523 = vadd.xlane.f32.xlu0 %v522_v1 }
  0xba   : > { %v524_v2 = vpop.xlane.xlu0 %523 }
  0xbb   : > { %v526_v3 = vmul.f32 0.03125, %v524_v2 }
  0xbd   : > { %v527_v4 = vsub.f32 %v2128_v0, %v526_v3 }
  0xbf   : > { %v528_v5 = vmul.f32 %v527_v4, %v527_v4 }
  0xc1   : > { %v529_v6 = vsel %vm521_vm0, %v528_v5, 0.0 }
  0xc2   : > { %530 = vadd.xlane.f32.xlu0 %v529_v6 }
 0x14b   : > { %v531_v10 = vpop.xlane.xlu0 %530 }
 0x14c   : > { %v532_v11 = vmul.f32 0.03125, %v531_v10 }
 0x14e   : > { %v533_v12 = vadd.f32 1e-05, %v532_v11 }
 0x150   : > { %1821 = vrsqrt.f32 %v533_v12 }
 0x15d   : > { %v1822_v13 = vpop.eup %1821 }
 0x15e   : > { %v535_v15 = vmul.f32 %v1822_v13, %v527_v4 }
 0x160   : > { %v543_v17 = vmul.f32 %v1544_v14, %v535_v15 }
 0x162   : > { %v551_v18 = vadd.f32 %v1545_v16, %v543_v17 }
 0x164   : > { %v552_v20 = vpack.c.bf16 %v551_v18, %v551_v18 }
 0x166   : > { %1630 = vmatmul.mubr.msk.bf16.vlgmr.msra.gmra.mxu1 %vm521_vm0, %v552_v20 }
 0x167   : > { %1634 = vmatpush3.bf16.msra.mxu1 %v1805_v19  ;;  %1637 = vmatprep.mubr.msk.bf16.mxu1 %vm1955_vm1, %v1954_v8 }
 0x168   : > { %1635 = vmatprep.subr.bf16.mxu1 %v1954_v8 }
 0x16b   : > { %1636 = vmatpush3.bf16.msra.mxu1 %v1806_v21 }
 0x16c   : > { %1641 = vmatprep.subr.bf16.mxu1 %v1954_v8 }
 0x16e   : > { %1638 = vmatmul.mubr.msk.bf16.vlgmr.msra.gmra.mxu1 %vm521_vm0, %v552_v20 }
 0x16f   : > { %1643 = vmatprep.mubr.msk.bf16.mxu1 %vm1955_vm1, %v1954_v8 }
 0x226   : > { %v613_v23 = vpop.f32.mrf.mxu1 }
 0x227   : > { %v614_v24 = vadd.f32 %v1546_v22, %v613_v23 }
 0x228   : > { %v1631_v25 = vpop.f32.mrf.mxu1 }
 0x229   : > { %v619_v26 = vpack.c.bf16 %v614_v24, %v614_v24 }
 0x22a   : > { %v616_v27 = vpop.f32.mrf.mxu1 }
 0x22b   : > { %621 = vst.msk [vmem:[#allocation3] sm:$0xf] %vm620_vm2, %v619_v26 }
 0x22c   : > { %v1632_v28 = vpop.f32.mrf.mxu1 }
 0x22e   : > { %v679_v30 = vpop.f32.mrf.mxu1 }
 0x22f   : > { %v680_v31 = vadd.f32 %v1550_v29, %v679_v30 }
 0x230   : > { %v1639_v32 = vpop.f32.mrf.mxu1 }
 0x231   : > { %v685_v33 = vpack.c.bf16 %v680_v31, %v680_v31 }
 0x232   : > { %v682_v34 = vpop.f32.mrf.mxu1  ;;  %v689_v35 = vld [vmem:[#allocation3] sm:$0xf] }
 0x233   : > { %687 = vst.msk [vmem:[#allocation2] sm:$0xf] %vm686_vm3, %v685_v33  ;;  %v695_v36 = vsel %vm690_vm4, %v689_v35, 0  ;;  %v2176_v37 = vcombine.low %v689_v35, %v689_v35 }
 0x234   : > { %v1640_v38 = vpop.f32.mrf.mxu1  ;;  %1642 = vmatpush3.bf16.xpose.msra.mxu1 %v695_v36 }
 0x235   : > { %916 = vrot.lane.b32.xlu0 %v2176_v37, %s1956_s24  ;;  %806 = vrot.lane.b32.xlu1 %v2176_v37, %s1957_s26 }
 0x236   : > { %1647 = vmatprep.subr.bf16.mxu1 %v1954_v8 }
 0x23a   : > { %v688_v39 = vld [vmem:[#allocation2] sm:$0xf] }
 0x23b   : > { %1644 = vmatmul.mubr.msk.bf16.vlgmr.msra.gmra.mxu1 %vm690_vm4, %v688_v39  ;;  %v1557_v40 = vcombine.low %v688_v39, %v688_v39 }
 0x23c   : > { %1649 = vmatprep.mubr.msk.bf16.mxu1 %vm1955_vm1, %v1954_v8 }
 0x23d   : > { %804 = vrot.lane.b32.xlu1 %v1557_v40, %s1957_s26 }
 0x241   : > { %914 = vrot.lane.b32.xlu1 %v1557_v40, %s1956_s24  ;;  %s1964_s24 = smov 16  }
 0x245   : > { %1026 = vrot.lane.b32.xlu1 %v2176_v37, %s1958_s25 }
 0x249   : > { %1024 = vrot.lane.b32.xlu1 %v1557_v40, %s1958_s25  ;;  %s1966_s25 = smov [#allocation8]  }
 0x2a7   : > { %v807_v41 = vpop.permute.xlu1 %806  ;;  %v917_v43 = vpop.permute.xlu0 %916 }
 0x2a8   : > { %v812_v42 = vsel %vm690_vm4, %v807_v41, 0  ;;  %v922_v45 = vsel %vm690_vm4, %v917_v43, 0 }
 0x2a9   : > { %1654 = vmatpush3.bf16.xpose.msra.mxu0 %v812_v42 }
 0x2aa   : > { %1665 = vmatprep.subr.bf16.mxu0 %v1954_v8 }
 0x2af   : > { %v805_v44 = vpop.permute.xlu1 %804 }
 0x2b0   : > { %1656 = vmatmul.mubr.msk.bf16.vlgmr.msra.gmra.mxu0 %vm690_vm4, %v805_v44 }
 0x2b1   : > { %1666 = vmatpush3.bf16.xpose.msra.mxu0 %v922_v45  ;;  %1667 = vmatprep.mubr.msk.bf16.mxu0 %vm1955_vm1, %v1954_v8 }
 0x2b2   : > { %1677 = vmatprep.subr.bf16.mxu0 %v1954_v8 }
 0x2b3   : > { %v915_v46 = vpop.permute.xlu1 %914 }
 0x2b7   : > { %v1027_v47 = vpop.permute.xlu1 %1026 }
 0x2b8   : > { %v1032_v48 = vsel %vm690_vm4, %v1027_v47, 0  ;;  %1668 = vmatmul.mubr.msk.bf16.vlgmr.msra.gmra.mxu0 %vm690_vm4, %v915_v46 }
 0x2b9   : > { %1678 = vmatpush3.bf16.xpose.msra.mxu0 %v1032_v48  ;;  %1679 = vmatprep.mubr.msk.bf16.mxu0 %vm1955_vm1, %v1954_v8 }
 0x2ba   : > { %1689 = vmatprep.subr.bf16.mxu0 %v1954_v8 }
 0x2bb   : > { %v1025_v49 = vpop.permute.xlu1 %1024 }
 0x2c0   : > { %1680 = vmatmul.mubr.msk.bf16.vlgmr.msra.gmra.mxu0 %vm690_vm4, %v1025_v49 }
 0x2c1   : > { %1693 = vmatprep.mubr.msk.bf16.mxu0 %vm1955_vm1, %v1954_v8 }
 0x2fb   : > { %v731_v50 = vpop.f32.mrf.mxu1 }
 0x2fc   : > { %v737_v51 = vsel %vm690_vm4, %v731_v50, -inf }
 0x2fd   : > { %738 = vmax.xlane.f32.xlu1 %v737_v51  ;;  %v1645_v52 = vpop.f32.mrf.mxu1 }
 0x2ff   : > { %v734_v53 = vpop.f32.mrf.mxu1 }
 0x301   : > { %v1646_v54 = vpop.f32.mrf.mxu1 }
 0x370   : > { %v848_v55 = vpop.f32.mrf.mxu0 }
 0x371   : > { %v854_v56 = vsel %vm690_vm4, %v848_v55, -inf }
 0x372   : > { %855 = vmax.xlane.f32.xlu0 %v854_v56  ;;  %v1657_v57 = vpop.f32.mrf.mxu0 }
 0x374   : > { %v851_v58 = vpop.f32.mrf.mxu0 }
 0x376   : > { %v1658_v59 = vpop.f32.mrf.mxu0 }
 0x378   : > { %v958_v60 = vpop.f32.mrf.mxu0 }
 0x379   : > { %v964_v61 = vsel %vm690_vm4, %v958_v60, -inf }
 0x37a   : > { %v1669_v62 = vpop.f32.mrf.mxu0  ;;  %965 = vmax.xlane.f32.xlu1 %v964_v61  ;;  %v1809_v61 = vld [vmem:[%s2363_s7 + $0x8] sm:$0xff]  }
 0x37b   : > { %1690 = vmatpush3.bf16.msra.mxu0 %v1809_v61  ;;  %v1575_v61 = vld [vmem:[%s2370_s14] ss:$0 sm:$0xff] }
 0x37c   : > { %v961_v63 = vpop.f32.mrf.mxu0  ;;  %1691 = vmatprep.subr.bf16.mxu0 %v1954_v8 }
 0x37d   : > { %v1810_v63 = vld [vmem:[%s2363_s7] sm:$0xff]  }
 0x37e   : > { %v1670_v1 = vpop.f32.mrf.mxu0 }
 0x37f   : > { %1692 = vmatpush3.bf16.msra.mxu0 %v1810_v63 }
 0x380   : > { %v1068_v2 = vpop.f32.mrf.mxu0  ;;  %1705 = vmatprep.subr.bf16.mxu0 %v1954_v8 }
 0x381   : > { %v1074_v3 = vsel %vm690_vm4, %v1068_v2, -inf }
 0x382   : > { %v1681_v4 = vpop.f32.mrf.mxu0  ;;  %1075 = vmax.xlane.f32.xlu1 %v1074_v3 }
 0x384   : > { %v1071_v5 = vpop.f32.mrf.mxu0 }
 0x386   : > { %v1682_v6 = vpop.f32.mrf.mxu0  ;;  %v739_v7 = vpop.xlane.xlu1 %738 }
 0x387   : > { %v740_v9 = vsub.f32 %v731_v50, %v739_v7 }
 0x389   : > { %v741_v10 = vmul.f32 1.442695, %v740_v9 }
 0x38b   : > { %1823 = vpow2.f32 %v741_v10 }
 0x398   : > { %v1824_v11 = vpop.eup %1823 }
 0x399   : > { %v743_v12 = vsel %vm690_vm4, %v1824_v11, 0.0 }
 0x39a   : > { %744 = vadd.xlane.f32.xlu0 %v743_v12 }
 0x3fb   : > { %v856_v13 = vpop.xlane.xlu0 %855 }
 0x3fc   : > { %v857_v14 = vsub.f32 %v848_v55, %v856_v13 }
 0x3fe   : > { %v858_v15 = vmul.f32 1.442695, %v857_v14 }
 0x400   : > { %1825 = vpow2.f32 %v858_v15 }
 0x403   : > { %v966_v16 = vpop.xlane.xlu1 %965 }
 0x404   : > { %v967_v17 = vsub.f32 %v958_v60, %v966_v16  ;;  %v1564_v16 = vld [vmem:[%s2364_s8] ss:$0 sm:$0xff] }
 0x406   : > { %v968_v18 = vmul.f32 1.442695, %v967_v17 }
 0x408   : > { %1827 = vpow2.f32 %v968_v18 }
 0x40b   : > { %v1076_v23 = vpop.xlane.xlu1 %1075 }
 0x40c   : > { %v1077_v24 = vsub.f32 %v1068_v2, %v1076_v23 }
 0x40d   : > { %v1826_v19 = vpop.eup %1825 }
 0x40e   : > { %v860_v20 = vsel %vm690_vm4, %v1826_v19, 0.0  ;;  %v1078_v25 = vmul.f32 1.442695, %v1077_v24 }
 0x40f   : > { %861 = vadd.xlane.f32.xlu1 %v860_v20 }
 0x410   : > { %1829 = vpow2.f32 %v1078_v25 }
 0x415   : > { %v1828_v21 = vpop.eup %1827 }
 0x416   : > { %v970_v22 = vsel %vm690_vm4, %v1828_v21, 0.0 }
 0x417   : > { %971 = vadd.xlane.f32.xlu0 %v970_v22 }
 0x41d   : > { %v1830_v26 = vpop.eup %1829 }
 0x41e   : > { %v1080_v27 = vsel %vm690_vm4, %v1830_v26, 0.0 }
 0x420   : > { %866 = vrot.lane.b32.xlu1 %v2176_v37, %s1959_s27  ;;  %s1965_s27 = smov 24  }
 0x423   : > { %v745_v28 = vpop.xlane.xlu0 %744 }
 0x424   : > { %1831 = vrcp.f32 %v745_v28 }
 0x42d   : > { %752 = vrot.lane.b32.xlu0 %v2176_v37, %s1960_s18  ;;  %s1585_s18 = sshll.u32 %s1943_s21, 7 }
 0x42e   : > { %s2309_s29 = scalar_lea.hbm %s2371_s15, %s1585_s18 }
 0x431   : > { %1086 = vrot.lane.b32.xlu0 %v2176_v37, %s1961_s22  ;;  %v1832_v30 = vpop.eup %1831 }
 0x432   : > { %v747_v32 = vmul.f32 %v1832_v30, %v1824_v11 }
 0x434   : > { %v748_v36 = vpack.c.bf16 %v747_v32, %v747_v32 }
 0x444   : > { %1081 = vadd.xlane.f32.xlu1 %v1080_v27 }
 0x455   : > { %976 = vrot.lane.b32.xlu1 %v2176_v37, %s1962_s20 }
 0x498   : > { %v862_v29 = vpop.xlane.xlu1 %861 }
 0x499   : > { %1833 = vrcp.f32 %v862_v29  ;;  %v1811_v29 = vld [vmem:[%s2367_s11 + $0x8] sm:$0xff]  }
 0x49c   : > { %v867_v35 = vpop.permute.xlu1 %866 }
 0x49d   : > { %v872_v39 = vsel %vm757_vm5, %v867_v35, 0 }
 0x4a0   : > { %v972_v31 = vpop.xlane.xlu0 %971 }
 0x4a1   : > { %1835 = vrcp.f32 %v972_v31 }
 0x4a4   : > { %v753_v33 = vpop.permute.xlu0 %752 }
 0x4a5   : > { %v759_v34 = vsel %vm757_vm5, %v753_v33, 0 }
 0x4a6   : > { %1648 = vmatpush3.bf16.msra.mxu1 %v759_v34  ;;  %v1834_v38 = vpop.eup %1833  ;;  %v1568_v34 = vld [vmem:[%s2365_s9] ss:$0 sm:$0xff] }
 0x4a7   : > { %1659 = vmatprep.subr.bf16.mxu1 %v1954_v8  ;;  %v864_v37 = vmul.f32 %v1834_v38, %v1826_v19 }
 0x4a8   : > { %v1087_v46 = vpop.permute.xlu0 %1086 }
 0x4a9   : > { %1650 = vmatmul.mubr.msk.bf16.vlgmr.msra.gmra.mxu1 %vm690_vm4, %v748_v36  ;;  %v865_v40 = vpack.c.bf16 %v864_v37, %v864_v37  ;;  %v1092_v48 = vsel %vm757_vm5, %v1087_v46, 0  ;;  %v1569_v36 = vld [vmem:[%s2366_s10] ss:$0 sm:$0xff]  ;;  %v1819_v46 = vld [vmem:[%s2369_s13 + $0x8] sm:$0xff]  }
 0x4aa   : > { %1660 = vmatpush3.bf16.msra.mxu1 %v872_v39  ;;  %1661 = vmatprep.mubr.msk.bf16.mxu1 %vm1955_vm1, %v1954_v8 }
 0x4ab   : > { %1671 = vmatprep.subr.bf16.mxu1 %v1954_v8 }
 0x4ae   : > { %v1836_v41 = vpop.eup %1835 }
 0x4af   : > { %v974_v43 = vmul.f32 %v1836_v41, %v1828_v21  ;;  %v1814_v41 = vld [vmem:[%s2369_s13 + $0x30] sm:$0xff]  }
 0x4b1   : > { %1662 = vmatmul.mubr.msk.bf16.vlgmr.msra.gmra.mxu1 %vm690_vm4, %v865_v40  ;;  %v975_v47 = vpack.c.bf16 %v974_v43, %v974_v43  ;;  %v1813_v40 = vld [vmem:[%s2369_s13 + $0x38] sm:$0xff]   ;;  %v1816_v43 = vld [vmem:[%s2369_s13 + $0x20] sm:$0xff]  }
 0x4b2   : > { %1673 = vmatprep.mubr.msk.bf16.mxu1 %vm1955_vm1, %v1954_v8 }
 0x4cd   : > { %v1082_v42 = vpop.xlane.xlu1 %1081 }
 0x4ce   : > { %1837 = vrcp.f32 %v1082_v42  ;;  %v1815_v42 = vld [vmem:[%s2369_s13 + $0x28] sm:$0xff]  }
 0x4d1   : > { %v977_v44 = vpop.permute.xlu1 %976 }
 0x4d2   : > { %v982_v45 = vsel %vm757_vm5, %v977_v44, 0  ;;  %v1817_v44 = vld [vmem:[%s2369_s13 + $0x18] sm:$0xff]  }
 0x4d3   : > { %1672 = vmatpush3.bf16.msra.mxu1 %v982_v45  ;;  %v1818_v45 = vld [vmem:[%s2369_s13 + $0x10] sm:$0xff]  }
 0x4d4   : > { %1683 = vmatprep.subr.bf16.mxu1 %v1954_v8 }
 0x4d6   : > { %1674 = vmatmul.mubr.msk.bf16.vlgmr.msra.gmra.mxu1 %vm690_vm4, %v975_v47  ;;  %v1820_v47 = vld [vmem:[%s2369_s13] sm:$0xff]  }
 0x4d7   : > { %1684 = vmatpush3.bf16.msra.mxu1 %v1092_v48  ;;  %1685 = vmatprep.mubr.msk.bf16.mxu1 %vm1955_vm1, %v1954_v8  ;;  %v1570_v48 = vld [vmem:[#allocation5] ss:$0 sm:$0xff] }
 0x4d8   : > { %1697 = vmatprep.subr.bf16.mxu1 %v1954_v8 }
 0x4db   : > { %v1838_v49 = vpop.eup %1837 }
 0x4dc   : > { %v1084_v50 = vmul.f32 %v1838_v49, %v1830_v26 }
 0x4de   : > { %v1085_v51 = vpack.c.bf16 %v1084_v50, %v1084_v50 }
 0x4e0   : > { %1686 = vmatmul.mubr.msk.bf16.vlgmr.msra.gmra.mxu1 %vm690_vm4, %v1085_v51 }
 0x4e1   : > { %1701 = vmatprep.mubr.msk.bf16.mxu1 %vm1955_vm1, %v1954_v8  ;;  %1698 = vmatpush3.bf16.msra.mxu1 %v1811_v29 }
 0x4e2   : > { %1699 = vmatprep.subr.bf16.mxu1 %v1954_v8 }
 0x569   : > { %v795_v52 = vpop.f32.mrf.mxu1 }
 0x56b   : > { %v1651_v53 = vpop.f32.mrf.mxu1 }
 0x56d   : > { %v798_v54 = vpop.f32.mrf.mxu1 }
 0x56f   : > { %v1652_v55 = vpop.f32.mrf.mxu1 }
 0x571   : > { %v908_v56 = vpop.f32.mrf.mxu1 }
 0x572   : > { %1135 = vrot.lane.b32.xlu1 %v908_v56, %s1963_s16 }
 0x573   : > { %v1663_v57 = vpop.f32.mrf.mxu1 }
 0x575   : > { %v911_v58 = vpop.f32.mrf.mxu1 }
 0x577   : > { %v1664_v59 = vpop.f32.mrf.mxu1 }
 0x596   : > { %v1018_v60 = vpop.f32.mrf.mxu1 }
 0x597   : > { %1139 = vrot.lane.b32.xlu0 %v1018_v60, %s1964_s24  ;;  %s510_s24 = sand.u32 1, %s1935_s19  }
 0x598   : > { %v1675_v62 = vpop.f32.mrf.mxu1  ;;  %s1542_s26 = sshll.u32 %s510_s24, 3  ;;  %s1441_s21 = scalar_lea.sflag [#allocation7], %s510_s24 }
 0x599   : > { %s512_s22 = scalar_lea.vmem [#allocation8], %s1542_s26 }
 0x59a   : > { %v1021_v1 = vpop.f32.mrf.mxu1  ;;  %s1455_s20 = sshll.u32 %s512_s22, 4  ;;  %s2311_s20 = int_to_ptr.vmem [resolvable:$true] %s1455_s20 }
 0x59b   : > { %s1871_s26 = scalar_lea.vmem %s2311_s20, 128 }
 0x59c   : > { %v1676_v2 = vpop.f32.mrf.mxu1  ;;  %p1872_p10 = scmp.ne.s32.totalorder %s2311_s20, %s1871_s26 }
 0x59e   : > { %p1873_p11 = pnand %p1872_p10, %p2087_p4 }
 0x5a0   : > { %v1128_v3 = vpop.f32.mrf.mxu1  ;;  %p1874_p13 = pneg %p1873_p11 }
 0x5a1   : > { %1143 = vrot.lane.b32.xlu1 %v1128_v3, %s1965_s27  ;;  %s1875_s27 = sshll.u32 %s1966_s25, 4  ;;  %s1876_s27 = int_to_ptr.vmem [resolvable:$false] %s1875_s27 }
 0x5a2   : > { %v1687_v4 = vpop.f32.mrf.mxu1  ;;  %s1877_s18 = scalar_lea.vmem %s1876_s27, 256  ;;  %p1878_p0 = scmp.lt.s32.totalorder %s2311_s20, %s1876_s27 }
 0x5a3   : > { %p1879_p1 = scmp.lt.s32.totalorder %s1877_s18, %s1871_s26 }
 0x5a4   : > { %v1131_v5 = vpop.f32.mrf.mxu1 }
 0x5a5   : > { %p1880_p2 = por %p1879_p1, %p1878_p0 }
 0x5a6   : > { %v1688_v6 = vpop.f32.mrf.mxu1 }
 0x5a7   : > { %p1881_p3 = pnand %p1880_p2, %p1874_p13 }
 0x5e4   : > { %v1136_v7 = vpop.permute.xlu1 %1135 }
 0x5e5   : > { %v1146_v10 = vsel %vm690_vm4, %v795_v52, %v1136_v7 }
 0x609   : > { %v1140_v9 = vpop.permute.xlu0 %1139 }
 0x60a   : > { %v1148_v11 = vsel %vm1147_vm6, %v1146_v10, %v1140_v9 }
 0x613   : > { %v1144_v12 = vpop.permute.xlu1 %1143 }
 0x614   : > { %v1150_v13 = vsel %vm1149_vm7, %v1148_v11, %v1144_v12 }
 0x615   : > { %v1151_v14 = vpack.c.bf16 %v1150_v13, %v1150_v13 }
 0x617   : > { %1152 = vst.msk [vmem:[#allocation4] sm:$0xf] %vm686_vm3, %v1151_v14 }
 0x61e   : > { %v1153_v15 = vld [vmem:[#allocation4] sm:$0xf] }
 0x61f   : > { %1694 = vmatmul.mubr.msk.bf16.vlgmr.msra.gmra.mxu0 %vm521_vm0, %v1153_v15 }
 0x620   : > { %1721 = vmatprep.mubr.msk.bf16.mxu0 %vm1955_vm1, %v1954_v8  ;;  %1706 = vmatpush3.bf16.msra.mxu0 %v1813_v40 }
 0x621   : > { %1707 = vmatprep.subr.bf16.mxu0 %v1954_v8 }
 0x624   : > { %1708 = vmatpush3.bf16.msra.mxu0 %v1814_v41 }
 0x625   : > { %1709 = vmatprep.subr.bf16.mxu0 %v1954_v8 }
 0x628   : > { %1710 = vmatpush3.bf16.msra.mxu0 %v1815_v42 }
 0x629   : > { %1711 = vmatprep.subr.bf16.mxu0 %v1954_v8 }
 0x62c   : > { %1712 = vmatpush3.bf16.msra.mxu0 %v1816_v43 }
 0x62d   : > { %1713 = vmatprep.subr.bf16.mxu0 %v1954_v8 }
 0x630   : > { %1714 = vmatpush3.bf16.msra.mxu0 %v1817_v44 }
 0x631   : > { %1715 = vmatprep.subr.bf16.mxu0 %v1954_v8 }
 0x634   : > { %1716 = vmatpush3.bf16.msra.mxu0 %v1818_v45 }
 0x635   : > { %1717 = vmatprep.subr.bf16.mxu0 %v1954_v8 }
 0x638   : > { %1718 = vmatpush3.bf16.msra.mxu0 %v1819_v46 }
 0x639   : > { %1719 = vmatprep.subr.bf16.mxu0 %v1954_v8 }
 0x63c   : > { %1720 = vmatpush3.bf16.msra.mxu0 %v1820_v47 }
 0x6df   : > { %v1214_v17 = vpop.f32.mrf.mxu0 }
 0x6e0   : > { %v1215_v18 = vadd.f32 %v1564_v16, %v1214_v17 }
 0x6e1   : > { %v1695_v19 = vpop.f32.mrf.mxu0 }
 0x6e2   : > { %v2249_v20 = vadd.f32 %v1215_v18, %v2128_v0  ;;  %v1812_v0 = vld [vmem:[%s2367_s11] sm:$0xff]  }
 0x6e3   : > { %v1217_v21 = vpop.f32.mrf.mxu0  ;;  %1700 = vmatpush3.bf16.msra.mxu1 %v1812_v0 }
 0x6e4   : > { %v1221_v22 = vsel %vm521_vm0, %v2249_v20, 0.0 }
 0x6e5   : > { %1222 = vadd.xlane.f32.xlu0 %v1221_v22  ;;  %v1696_v23 = vpop.f32.mrf.mxu0 }
 0x76e   : > { %v1223_v24 = vpop.xlane.xlu0 %1222 }
 0x76f   : > { %v1224_v25 = vmul.f32 0.03125, %v1223_v24 }
 0x771   : > { %v1225_v26 = vsub.f32 %v2249_v20, %v1224_v25 }
 0x773   : > { %v1226_v27 = vmul.f32 %v1225_v26, %v1225_v26 }
 0x775   : > { %v1227_v28 = vsel %vm521_vm0, %v1226_v27, 0.0 }
 0x776   : > { %1228 = vadd.xlane.f32.xlu1 %v1227_v28 }
 0x7ff   : > { %v1229_v30 = vpop.xlane.xlu1 %1228 }
 0x800   : > { %v1230_v31 = vmul.f32 0.03125, %v1229_v30 }
 0x802   : > { %v1231_v32 = vadd.f32 1e-05, %v1230_v31 }
 0x804   : > { %1839 = vrsqrt.f32 %v1231_v32 }
 0x811   : > { %v1840_v33 = vpop.eup %1839 }
 0x812   : > { %v1233_v35 = vmul.f32 %v1840_v33, %v1225_v26 }
 0x814   : > { %v1241_v38 = vmul.f32 %v1568_v34, %v1233_v35 }
 0x816   : > { %v1249_v39 = vadd.f32 %v1569_v36, %v1241_v38 }
 0x818   : > { %v1250_v37 = vpack.c.bf16 %v1249_v39, %v1249_v39 }
 0x81a   : > { %1702 = vmatmul.mubr.msk.bf16.vlgmr.msra.gmra.mxu1 %vm521_vm0, %v1250_v37 }
 0x8da   : > { %v1311_v49 = vpop.f32.mrf.mxu1 }
 0x8db   : > { %v1312_v50 = vadd.f32 %v1570_v48, %v1311_v49 }
 0x8dc   : > { %v1703_v51 = vpop.f32.mrf.mxu1 }
 0x8dd   : > { %v1317_v52 = vpack.c.bf16 %v1312_v50, %v1312_v50 }
 0x8de   : > { %v1314_v53 = vpop.f32.mrf.mxu1 }
 0x8df   : > { %v1574_v54 = vmul.bf16 3218784218, %v1317_v52 }
 0x8e0   : > { %v1704_v55 = vpop.f32.mrf.mxu1 }
 0x8e1   : > { %v1321_v56 = vmul.bf16 1069105081, %v1574_v54 }
 0x8e3   : > { %1841 = vpow.bf16 %v1321_v56 }
 0x8f1   : > { %v1842_v57 = vpop.eup %1841 }
 0x8f2   : > { %v1323_v58 = vadd.bf16 1065369472, %v1842_v57 }
 0x8f4   : > { %1843 = vrcp.bf16 %v1323_v58 }
 0x902   : > { %v1844_v8 = vpop.eup %1843 }
 0x903   : > { %v1325_v59 = vmul.bf16 1065369472, %v1844_v8 }
 0x905   : > { %v1326_v60 = vmul.bf16 %v1325_v59, %v1317_v52 }
 0x907   : > { %1722 = vmatmul.mubr.bf16.vlgmr.msra.gmra.mxu0 %v1326_v60 }
 0x9c7   : > { %v1432_v62 = vpop.f32.mrf.mxu0 }
 0x9c8   : > { %v1433_v63 = vadd.f32 %v1575_v61, %v1432_v62 }
 0x9c9   : > { %v1723_v1 = vpop.f32.mrf.mxu0 }
 0x9ca   : > { %v1438_v2 = vadd.f32 %v1433_v63, %v2249_v20 }
 0x9cb   : > { %v1435_v3 = vpop.f32.mrf.mxu0 }
 0x9cc   : > { %1439 = vst.msk [vmem:[%s512_s22] sm:$0xff] %vm521_vm0, %v1438_v2 }
 0x9cd   : > { %v1724_v4 = vpop.f32.mrf.mxu0 }
 0x9ce   : > { %1884 = shalt.err (!%p1881_p3)
}
 0x9cf   : > { %s1885_s22 = scalar_lea.hbm %s2309_s29, 128  ;;  %s1889_s17 = scalar_lea.hbm %s2371_s15, 256 }
 0x9d0   : > { %p1886_p5 = scmp.ne.s32.totalorder %s2309_s29, %s1885_s22  ;;  %p1890_p9 = scmp.lt.s32.totalorder %s2309_s29, %s2371_s15 }
 0x9d1   : > { %p1891_p12 = scmp.lt.s32.totalorder %s1889_s17, %s1885_s22 }
 0x9d2   : > { %p1887_p6 = pnand %p1886_p5, %p2087_p4 }
 0x9d3   : > { %p1892_p10 = por %p1891_p12, %p1890_p9 }
 0x9d4   : > { %p1888_p7 = pneg %p1887_p6 }
 0x9d6   : > { %p1893_p11 = pnand %p1892_p10, %p1888_p7 }
 0x9d8   : > { %1896 = shalt.err (!%p1893_p11)
}
 0x9d9   : > { %1729 = dma.vmem_to_hbm [thread:$0]  (%p2087_p4), %s2311_s20, 128, %s2309_s29, %s1441_s21  }
 0x9da PF: > { %s2387_s26 = sld [smem:[#allocation11_spill]]  ;;  %p1741_p13 = scmp.ge.s32.totalorder %s1951_s23, 2 }
 0x9dc   : > { %p1736_p0 = pnand %p1741_p13, %p2094_p8 }
 0x9de   : > { %p1737_p1 = pneg %p1736_p0 }
 0x9e0   : > { %s1467_s27 = sand.u32 1, %s2387_s26  }
 0x9e1   : > { %s1468_s0 = scalar_lea.sflag [#allocation7], %s1467_s27 }
 0x9e2   : > { %1926 = dma.done.wait (%p1737_p1), %s1468_s0, 128  }
 0x9e3   : > { %1928 = vsyncadd (%p1737_p1), %s1468_s0, 4294967168  ;;  %s29_s23 = sadd.s32 1, %s1951_s23   ;;  %s2388_s28 = sld [smem:[#allocation12_spill]] }
 0x9e4   : > { %p26_p2 = scmp.ge.s32.totalorder %s29_s23, 4   ;;  %s2389_s20 = sld [smem:[#allocation15_spill]] }
 0x9e5   : > { %s2390_s21 = sld [smem:[#allocation13_spill]]  ;;  %s2392_s18 = smov %s1935_s19 }
 0x9e6   : > { %s2391_s22 = sld [smem:[#allocation14_spill]]  ;;  %28 = sbr.rel (!%p26_p2) target bundleno = 7 (0x7), region = 120 }
 0x9e9   : > { %s2393_s19 = smov %s2388_s28 }
 0x9eb   :  { %1473 = vsyncpa [#allocation6], 1 }
 0x9ec   :  { %1475 = vsyncpa [#allocation6 + $0x1], 1 }
 0x9ed   :  { %1476 = vsyncpa [#allocation7], 1 }
 0x9ee   :  { %1478 = vsyncpa [#allocation7 + $0x1], 1 }

// kernel: tpu_custom_call.1
= control target key start
LH: loop header
LB: loop body
LE: loop exit
PB: predicated region body
PF: predicated region fallthrough
CT: control target
= control target key end

     0   :  { %s2356_s0 = inlined_call_operand.vmem [shape: f32[2,8,32], index: 0, kind: input, shape index: {}]   ;;  %s2357_s1 = inlined_call_operand.vmem [shape: f32[1,32], index: 1, kind: input, shape index: {}]   ;;  %s2358_s2 = inlined_call_operand.vmem [shape: f32[1,32], index: 2, kind: input, shape index: {}]   ;;  %s2359_s3 = inlined_call_operand.vmem [shape: bf16[32,32], index: 3, kind: input, shape index: {}]   ;;  %s2360_s4 = inlined_call_operand.vmem [shape: f32[1,32], index: 4, kind: input, shape index: {}]   ;;  %s2361_s5 = inlined_call_operand.vmem [shape: bf16[32,64], index: 5, kind: input, shape index: {}]   ;;  %s2362_s6 = inlined_call_operand.vmem [shape: f32[1,64], index: 6, kind: input, shape index: {}]   ;;  %s2363_s7 = inlined_call_operand.vmem [shape: bf16[32,32], index: 7, kind: input, shape index: {}]   ;;  %s2364_s8 = inlined_call_operand.vmem [shape: f32[1,32], index: 8, kind: input, shape index: {}]   ;;  %s2365_s9 = inlined_call_operand.vmem [shape: f32[1,32], index: 9, kind: input, shape index: {}]   ;;  %s2366_s10 = inlined_call_operand.vmem [shape: f32[1,32], index: 10, kind: input, shape index: {}]   ;;  %s2367_s11 = inlined_call_operand.vmem [shape: bf16[32,128], index: 11, kind: input, shape index: {}]   ;;  %s2368_s12 = inlined_call_operand.hbm [shape: f32[1,128], index: 12, kind: input, shape index: {}]   ;;  %s2369_s13 = inlined_call_operand.vmem [shape: bf16[128,32], index: 13, kind: input, shape index: {}]   ;;  %s2370_s14 = inlined_call_operand.vmem [shape: f32[1,32], index: 14, kind: input, shape index: {}]   ;;  %s2371_s15 = inlined_call_operand.hbm [shape: f32[2,8,32], index: 15, kind: output, shape index: {}]  }
   0x1   :  { %2376 = sst [smem:[#allocation16_spill]] %s2356_s0 }
   0x2   :  { %20 = vsyncpa [#allocation6], 0 }
   0x3   :  { %21 = vsyncpa [#allocation7], 0 }
   0x4   :  { %23 = vsyncpa [#allocation7 + $0x1], 0  ;;  %s2047_s18 = smov 0   ;;  %s2049_s19 = smov 0  }
   0x5   :  { %s2051_s20 = smov 0   ;;  %s2053_s21 = smov 0  }
   0x6   :  { %s2055_s22 = smov 0   ;;  %s2057_s23 = smov 0  }
   0x7 LB: > { %2377 = sst [smem:[#allocation11_spill]] %s1931_s18  ;;  %s1535_s24 = sadd.s32 4294967295, %s1951_s23   ;;  %s1951_s23 = sphi %s2057_s23, %s29_s23   ;;  %s1947_s22 = sphi %s2055_s22, %s2391_s22   ;;  %s1943_s21 = sphi %s2053_s21, %s2390_s21   ;;  %s1939_s20 = sphi %s2051_s20, %s2389_s20   ;;  %s1935_s19 = sphi %s2049_s19, %s2393_s19   ;;  %s1931_s18 = sphi %s2047_s18, %s2392_s18  }
   0x8   : > { %2378 = sst [smem:[#allocation12_spill]] %s1939_s20  ;;  %s1536_s25 = sadd.s32 4294967294, %s1951_s23  }
   0x9   : > { %2379 = sst [smem:[#allocation13_spill]] %s1947_s22  ;;  %s41_s26 = sadd.s32 1, %s1947_s22 }
   0xa   : > { %s370_s27 = sadd.s32 1, %s1939_s20  ;;  %p43_p0 = scmp.ge.s32.totalorder %s41_s26, 2 }
   0xb   : > { %p380_p1 = scmp.ne.s32.totalorder %s1939_s20, %s1935_s19  ;;  %p381_p2 = scmp.eq.s32.totalorder %s1535_s24, 1 }
   0xc   : > { %p386_p3 = scmp.ne.s32.totalorder %s1935_s19, %s1931_s18  ;;  %s2395_s26 = smov (%p43_p0, %s41_s26), 0 }
   0xd   : > { %2380 = sst [smem:[#allocation14_spill]] %s2395_s26  ;;  %p2087_p4 = por %p381_p2, %p380_p1 }
   0xe   : > { %p387_p5 = scmp.eq.s32.totalorder %s1536_s25, 1  ;;  %s365_s29 = ssub.s32 %s1947_s22, %s2395_s26 }
   0xf   : > { %p1537_p6 = scmp.ge.s32.totalorder %s1951_s23, 1  ;;  %p368_p7 = scmp.eq.s32.totalorder %s365_s29, 0 }
  0x10   : > { %p2094_p8 = por %p387_p5, %p386_p3  ;;  %p394_p9 = scmp.lt.s32.totalorder %s1951_s23, 3 }
  0x11   : > { %s2100_s16 = scalar_select %p368_p7, %s1939_s20, %s370_s27  }
  0x12   : > { %p2102_p10 = pnand %p1537_p6, %p394_p9  ;;  %p2106_p11 = scmp.eq.s32.totalorder %s1535_s24, 0 }
  0x13   : > { %2383 = sst [smem:[#allocation15_spill]] %s2100_s16  ;;  %s1953_s25 = smov [#allocation5]  }
  0x14   : > { %p1731_p12 = pneg %p2102_p10  ;;  %s440_s29 = sshll.u32 %s1953_s25, 4  ;;  %s441_s29 = int_to_ptr.vmem [resolvable:$true] %s440_s29 }
  0x15   : > { %s1856_s27 = scalar_lea.vmem %s441_s29, 16  ;;  %s1863_s26 = scalar_lea.vmem %s441_s29, 32 }
  0x16   : > { %p1732_p13 = pnand %p2106_p11, %p1731_p12  ;;  %p1857_p1 = scmp.ne.s32.totalorder %s441_s29, %s1856_s27 }
  0x17   : > { %p1864_p5 = scmp.lt.s32.totalorder %s441_s29, %s441_s29  ;;  %p1865_p6 = scmp.lt.s32.totalorder %s1863_s26, %s1856_s27 }
  0x18   : > { %p1847_p0 = pneg %p1732_p13 }
  0x19   : > { %p1866_p7 = por %p1865_p6, %p1864_p5 }
  0x1a   : > { %p1859_p2 = pnand %p1857_p1, %p1847_p0 }
  0x1c   : > { %p1860_p3 = pneg %p1859_p2 }
  0x1e   : > { %p1867_p9 = pnand %p1866_p7, %p1860_p3 }
  0x20   : > { %1870 = shalt.err (!%p1867_p9)
}
  0x21   : > { %1734 = dma.hbm_to_vmem [thread:$0]  (!%p1732_p13), %s2368_s12, 16, %s441_s29, [#allocation6]  }
  0x22   : > { %466 = sbr.rel (%p2102_p10) target bundleno = 2522 (0x9da), region = 80 }
  0x27   : > { %1922 = dma.done.wait (%p2106_p11), [#allocation6], 16  }
  0x28   : > { %1924 = vsyncadd (%p2106_p11), [#allocation6], 4294967280  ;;  %p513_p12 = scmp.lt.s32.totalorder %s1943_s21, 1  ;;  %s2386_s0 = sld [smem:[#allocation16_spill]]  ;;  %vm521_vm0 = vcmask 261120   ;;  %v1803_v7 = vld [vmem:[%s2361_s5 + $0x8] sm:$0xff]  }
  0x29   : > { %v1954_v8 = vmov 0.0   ;;  %vm1955_vm1 = vmmov 0   ;;  %v1804_v9 = vld [vmem:[%s2361_s5] sm:$0xff]   ;;  %v1805_v19 = vld [vmem:[%s2359_s3 + $0x8] sm:$0xff]   ;;  %vm620_vm2 = vcmask 519168   ;;  %vm686_vm3 = vcmask 257024  }
  0x2a   : > { %s514_s26 = scalar_select %p513_p12, %s1943_s21, 1  ;;  %1625 = vmatprep.subr.bf16.mxu1 %v1954_v8  ;;  %1629 = vmatprep.mubr.msk.bf16.mxu1 %vm1955_vm1, %v1954_v8  ;;  %v1544_v14 = vld [vmem:[%s2357_s1] ss:$0 sm:$0xff]  ;;  %vm690_vm4 = vcmask 64512   ;;  %vm757_vm5 = vcmask 1043456   ;;  %vm1147_vm6 = vcmask 130048  }
  0x2b   : > { %1626 = vmatpush3.bf16.msra.mxu1 %v1803_v7  ;;  %1653 = vmatprep.subr.bf16.mxu0 %v1954_v8  ;;  %v1545_v16 = vld [vmem:[%s2358_s2] ss:$0 sm:$0xff]  ;;  %s1956_s24 = smov 112   ;;  %s1959_s27 = smov 88   ;;  %vm1149_vm7 = vcmask 195584  }
  0x2c   : > { %s1543_s25 = sshll.u32 %s514_s26, 3  ;;  %1627 = vmatprep.subr.bf16.mxu1 %v1954_v8  ;;  %1655 = vmatprep.mubr.msk.bf16.mxu0 %vm1955_vm1, %v1954_v8  ;;  %v1806_v21 = vld [vmem:[%s2359_s3] sm:$0xff]   ;;  %s1957_s26 = smov 120  }
  0x2d   : > { %v1546_v22 = vld [vmem:[%s2362_s6] ss:$0 sm:$0xff]  ;;  %s1960_s18 = smov 96   ;;  %s1961_s22 = smov 72  }
  0x2e   : > { %s516_s20 = scalar_lea.vmem %s2386_s0, %s1543_s25  ;;  %v1550_v29 = vld [vmem:[%s2360_s4] ss:$0 sm:$0xff]  ;;  %s1958_s25 = smov 104  }
  0x2f   : > { %v2128_v0 = vld [vmem:[%s516_s20] sm:$0xff]  ;;  %1628 = vmatpush3.bf16.msra.mxu1 %v1804_v9  ;;  %s1962_s20 = smov 80   ;;  %s1963_s16 = smov 8  }
  0x30   : > { %v522_v1 = vsel %vm521_vm0, %v2128_v0, 0.0  ;;  %1633 = vmatprep.subr.bf16.mxu1 %v1954_v8 }
  0x31   : > { %523 = vadd.xlane.f32.xlu0 %v522_v1 }
  0xba   : > { %v524_v2 = vpop.xlane.xlu0 %523 }
  0xbb   : > { %v526_v3 = vmul.f32 0.03125, %v524_v2 }
  0xbd   : > { %v527_v4 = vsub.f32 %v2128_v0, %v526_v3 }
  0xbf   : > { %v528_v5 = vmul.f32 %v527_v4, %v527_v4 }
  0xc1   : > { %v529_v6 = vsel %vm521_vm0, %v528_v5, 0.0 }
  0xc2   : > { %530 = vadd.xlane.f32.xlu0 %v529_v6 }
 0x14b   : > { %v531_v10 = vpop.xlane.xlu0 %530 }
 0x14c   : > { %v532_v11 = vmul.f32 0.03125, %v531_v10 }
 0x14e   : > { %v533_v12 = vadd.f32 1e-05, %v532_v11 }
 0x150   : > { %1821 = vrsqrt.f32 %v533_v12 }
 0x15d   : > { %v1822_v13 = vpop.eup %1821 }
 0x15e   : > { %v535_v15 = vmul.f32 %v1822_v13, %v527_v4 }
 0x160   : > { %v543_v17 = vmul.f32 %v1544_v14, %v535_v15 }
 0x162   : > { %v551_v18 = vadd.f32 %v1545_v16, %v543_v17 }
 0x164   : > { %v552_v20 = vpack.c.bf16 %v551_v18, %v551_v18 }
 0x166   : > { %1630 = vmatmul.mubr.msk.bf16.vlgmr.msra.gmra.mxu1 %vm521_vm0, %v552_v20 }
 0x167   : > { %1634 = vmatpush3.bf16.msra.mxu1 %v1805_v19  ;;  %1637 = vmatprep.mubr.msk.bf16.mxu1 %vm1955_vm1, %v1954_v8 }
 0x168   : > { %1635 = vmatprep.subr.bf16.mxu1 %v1954_v8 }
 0x16b   : > { %1636 = vmatpush3.bf16.msra.mxu1 %v1806_v21 }
 0x16c   : > { %1641 = vmatprep.subr.bf16.mxu1 %v1954_v8 }
 0x16e   : > { %1638 = vmatmul.mubr.msk.bf16.vlgmr.msra.gmra.mxu1 %vm521_vm0, %v552_v20 }
 0x16f   : > { %1643 = vmatprep.mubr.msk.bf16.mxu1 %vm1955_vm1, %v1954_v8 }
 0x226   : > { %v613_v23 = vpop.f32.mrf.mxu1 }
 0x227   : > { %v614_v24 = vadd.f32 %v1546_v22, %v613_v23 }
 0x228   : > { %v1631_v25 = vpop.f32.mrf.mxu1 }
 0x229   : > { %v619_v26 = vpack.c.bf16 %v614_v24, %v614_v24 }
 0x22a   : > { %v616_v27 = vpop.f32.mrf.mxu1 }
 0x22b   : > { %621 = vst.msk [vmem:[#allocation3] sm:$0xf] %vm620_vm2, %v619_v26 }
 0x22c   : > { %v1632_v28 = vpop.f32.mrf.mxu1 }
 0x22e   : > { %v679_v30 = vpop.f32.mrf.mxu1 }
 0x22f   : > { %v680_v31 = vadd.f32 %v1550_v29, %v679_v30 }
 0x230   : > { %v1639_v32 = vpop.f32.mrf.mxu1 }
 0x231   : > { %v685_v33 = vpack.c.bf16 %v680_v31, %v680_v31 }
 0x232   : > { %v682_v34 = vpop.f32.mrf.mxu1  ;;  %v689_v35 = vld [vmem:[#allocation3] sm:$0xf] }
 0x233   : > { %687 = vst.msk [vmem:[#allocation2] sm:$0xf] %vm686_vm3, %v685_v33  ;;  %v695_v36 = vsel %vm690_vm4, %v689_v35, 0  ;;  %v2176_v37 = vcombine.low %v689_v35, %v689_v35 }
 0x234   : > { %v1640_v38 = vpop.f32.mrf.mxu1  ;;  %1642 = vmatpush3.bf16.xpose.msra.mxu1 %v695_v36 }
 0x235   : > { %916 = vrot.lane.b32.xlu0 %v2176_v37, %s1956_s24  ;;  %806 = vrot.lane.b32.xlu1 %v2176_v37, %s1957_s26 }
 0x236   : > { %1647 = vmatprep.subr.bf16.mxu1 %v1954_v8 }
 0x23a   : > { %v688_v39 = vld [vmem:[#allocation2] sm:$0xf] }
 0x23b   : > { %1644 = vmatmul.mubr.msk.bf16.vlgmr.msra.gmra.mxu1 %vm690_vm4, %v688_v39  ;;  %v1557_v40 = vcombine.low %v688_v39, %v688_v39 }
 0x23c   : > { %1649 = vmatprep.mubr.msk.bf16.mxu1 %vm1955_vm1, %v1954_v8 }
 0x23d   : > { %804 = vrot.lane.b32.xlu1 %v1557_v40, %s1957_s26 }
 0x241   : > { %914 = vrot.lane.b32.xlu1 %v1557_v40, %s1956_s24  ;;  %s1964_s24 = smov 16  }
 0x245   : > { %1026 = vrot.lane.b32.xlu1 %v2176_v37, %s1958_s25 }
 0x249   : > { %1024 = vrot.lane.b32.xlu1 %v1557_v40, %s1958_s25  ;;  %s1966_s25 = smov [#allocation8]  }
 0x2a7   : > { %v807_v41 = vpop.permute.xlu1 %806  ;;  %v917_v43 = vpop.permute.xlu0 %916 }
 0x2a8   : > { %v812_v42 = vsel %vm690_vm4, %v807_v41, 0  ;;  %v922_v45 = vsel %vm690_vm4, %v917_v43, 0 }
 0x2a9   : > { %1654 = vmatpush3.bf16.xpose.msra.mxu0 %v812_v42 }
 0x2aa   : > { %1665 = vmatprep.subr.bf16.mxu0 %v1954_v8 }
 0x2af   : > { %v805_v44 = vpop.permute.xlu1 %804 }
 0x2b0   : > { %1656 = vmatmul.mubr.msk.bf16.vlgmr.msra.gmra.mxu0 %vm690_vm4, %v805_v44 }
 0x2b1   : > { %1666 = vmatpush3.bf16.xpose.msra.mxu0 %v922_v45  ;;  %1667 = vmatprep.mubr.msk.bf16.mxu0 %vm1955_vm1, %v1954_v8 }
 0x2b2   : > { %1677 = vmatprep.subr.bf16.mxu0 %v1954_v8 }
 0x2b3   : > { %v915_v46 = vpop.permute.xlu1 %914 }
 0x2b7   : > { %v1027_v47 = vpop.permute.xlu1 %1026 }
 0x2b8   : > { %v1032_v48 = vsel %vm690_vm4, %v1027_v47, 0  ;;  %1668 = vmatmul.mubr.msk.bf16.vlgmr.msra.gmra.mxu0 %vm690_vm4, %v915_v46 }
 0x2b9   : > { %1678 = vmatpush3.bf16.xpose.msra.mxu0 %v1032_v48  ;;  %1679 = vmatprep.mubr.msk.bf16.mxu0 %vm1955_vm1, %v1954_v8 }
 0x2ba   : > { %1689 = vmatprep.subr.bf16.mxu0 %v1954_v8 }
 0x2bb   : > { %v1025_v49 = vpop.permute.xlu1 %1024 }
 0x2c0   : > { %1680 = vmatmul.mubr.msk.bf16.vlgmr.msra.gmra.mxu0 %vm690_vm4, %v1025_v49 }
 0x2c1   : > { %1693 = vmatprep.mubr.msk.bf16.mxu0 %vm1955_vm1, %v1954_v8 }
 0x2fb   : > { %v731_v50 = vpop.f32.mrf.mxu1 }
 0x2fc   : > { %v737_v51 = vsel %vm690_vm4, %v731_v50, -inf }
 0x2fd   : > { %738 = vmax.xlane.f32.xlu1 %v737_v51  ;;  %v1645_v52 = vpop.f32.mrf.mxu1 }
 0x2ff   : > { %v734_v53 = vpop.f32.mrf.mxu1 }
 0x301   : > { %v1646_v54 = vpop.f32.mrf.mxu1 }
 0x370   : > { %v848_v55 = vpop.f32.mrf.mxu0 }
 0x371   : > { %v854_v56 = vsel %vm690_vm4, %v848_v55, -inf }
 0x372   : > { %855 = vmax.xlane.f32.xlu0 %v854_v56  ;;  %v1657_v57 = vpop.f32.mrf.mxu0 }
 0x374   : > { %v851_v58 = vpop.f32.mrf.mxu0 }
 0x376   : > { %v1658_v59 = vpop.f32.mrf.mxu0 }
 0x378   : > { %v958_v60 = vpop.f32.mrf.mxu0 }
 0x379   : > { %v964_v61 = vsel %vm690_vm4, %v958_v60, -inf }
 0x37a   : > { %v1669_v62 = vpop.f32.mrf.mxu0  ;;  %965 = vmax.xlane.f32.xlu1 %v964_v61  ;;  %v1809_v61 = vld [vmem:[%s2363_s7 + $0x8] sm:$0xff]  }
 0x37b   : > { %1690 = vmatpush3.bf16.msra.mxu0 %v1809_v61  ;;  %v1575_v61 = vld [vmem:[%s2370_s14] ss:$0 sm:$0xff] }
 0x37c   : > { %v961_v63 = vpop.f32.mrf.mxu0  ;;  %1691 = vmatprep.subr.bf16.mxu0 %v1954_v8 }
 0x37d   : > { %v1810_v63 = vld [vmem:[%s2363_s7] sm:$0xff]  }
 0x37e   : > { %v1670_v1 = vpop.f32.mrf.mxu0 }
 0x37f   : > { %1692 = vmatpush3.bf16.msra.mxu0 %v1810_v63 }
 0x380   : > { %v1068_v2 = vpop.f32.mrf.mxu0  ;;  %1705 = vmatprep.subr.bf16.mxu0 %v1954_v8 }
 0x381   : > { %v1074_v3 = vsel %vm690_vm4, %v1068_v2, -inf }
 0x382   : > { %v1681_v4 = vpop.f32.mrf.mxu0  ;;  %1075 = vmax.xlane.f32.xlu1 %v1074_v3 }
 0x384   : > { %v1071_v5 = vpop.f32.mrf.mxu0 }
 0x386   : > { %v1682_v6 = vpop.f32.mrf.mxu0  ;;  %v739_v7 = vpop.xlane.xlu1 %738 }
 0x387   : > { %v740_v9 = vsub.f32 %v731_v50, %v739_v7 }
 0x389   : > { %v741_v10 = vmul.f32 1.442695, %v740_v9 }
 0x38b   : > { %1823 = vpow2.f32 %v741_v10 }
 0x398   : > { %v1824_v11 = vpop.eup %1823 }
 0x399   : > { %v743_v12 = vsel %vm690_vm4, %v1824_v11, 0.0 }
 0x39a   : > { %744 = vadd.xlane.f32.xlu0 %v743_v12 }
 0x3fb   : > { %v856_v13 = vpop.xlane.xlu0 %855 }
 0x3fc   : > { %v857_v14 = vsub.f32 %v848_v55, %v856_v13 }
 0x3fe   : > { %v858_v15 = vmul.f32 1.442695, %v857_v14 }
 0x400   : > { %1825 = vpow2.f32 %v858_v15 }
 0x403   : > { %v966_v16 = vpop.xlane.xlu1 %965 }
 0x404   : > { %v967_v17 = vsub.f32 %v958_v60, %v966_v16  ;;  %v1564_v16 = vld [vmem:[%s2364_s8] ss:$0 sm:$0xff] }
 0x406   : > { %v968_v18 = vmul.f32 1.442695, %v967_v17 }
 0x408   : > { %1827 = vpow2.f32 %v968_v18 }
 0x40b   : > { %v1076_v23 = vpop.xlane.xlu1 %1075 }
 0x40c   : > { %v1077_v24 = vsub.f32 %v1068_v2, %v1076_v23 }
 0x40d   : > { %v1826_v19 = vpop.eup %1825 }
 0x40e   : > { %v860_v20 = vsel %vm690_vm4, %v1826_v19, 0.0  ;;  %v1078_v25 = vmul.f32 1.442695, %v1077_v24 }
 0x40f   : > { %861 = vadd.xlane.f32.xlu1 %v860_v20 }
 0x410   : > { %1829 = vpow2.f32 %v1078_v25 }
 0x415   : > { %v1828_v21 = vpop.eup %1827 }
 0x416   : > { %v970_v22 = vsel %vm690_vm4, %v1828_v21, 0.0 }
 0x417   : > { %971 = vadd.xlane.f32.xlu0 %v970_v22 }
 0x41d   : > { %v1830_v26 = vpop.eup %1829 }
 0x41e   : > { %v1080_v27 = vsel %vm690_vm4, %v1830_v26, 0.0 }
 0x420   : > { %866 = vrot.lane.b32.xlu1 %v2176_v37, %s1959_s27  ;;  %s1965_s27 = smov 24  }
 0x423   : > { %v745_v28 = vpop.xlane.xlu0 %744 }
 0x424   : > { %1831 = vrcp.f32 %v745_v28 }
 0x42d   : > { %752 = vrot.lane.b32.xlu0 %v2176_v37, %s1960_s18  ;;  %s1585_s18 = sshll.u32 %s1943_s21, 7 }
 0x42e   : > { %s2309_s29 = scalar_lea.hbm %s2371_s15, %s1585_s18 }
 0x431   : > { %1086 = vrot.lane.b32.xlu0 %v2176_v37, %s1961_s22  ;;  %v1832_v30 = vpop.eup %1831 }
 0x432   : > { %v747_v32 = vmul.f32 %v1832_v30, %v1824_v11 }
 0x434   : > { %v748_v36 = vpack.c.bf16 %v747_v32, %v747_v32 }
 0x444   : > { %1081 = vadd.xlane.f32.xlu1 %v1080_v27 }
 0x455   : > { %976 = vrot.lane.b32.xlu1 %v2176_v37, %s1962_s20 }
 0x498   : > { %v862_v29 = vpop.xlane.xlu1 %861 }
 0x499   : > { %1833 = vrcp.f32 %v862_v29  ;;  %v1811_v29 = vld [vmem:[%s2367_s11 + $0x8] sm:$0xff]  }
 0x49c   : > { %v867_v35 = vpop.permute.xlu1 %866 }
 0x49d   : > { %v872_v39 = vsel %vm757_vm5, %v867_v35, 0 }
 0x4a0   : > { %v972_v31 = vpop.xlane.xlu0 %971 }
 0x4a1   : > { %1835 = vrcp.f32 %v972_v31 }
 0x4a4   : > { %v753_v33 = vpop.permute.xlu0 %752 }
 0x4a5   : > { %v759_v34 = vsel %vm757_vm5, %v753_v33, 0 }
 0x4a6   : > { %1648 = vmatpush3.bf16.msra.mxu1 %v759_v34  ;;  %v1834_v38 = vpop.eup %1833  ;;  %v1568_v34 = vld [vmem:[%s2365_s9] ss:$0 sm:$0xff] }
 0x4a7   : > { %1659 = vmatprep.subr.bf16.mxu1 %v1954_v8  ;;  %v864_v37 = vmul.f32 %v1834_v38, %v1826_v19 }
 0x4a8   : > { %v1087_v46 = vpop.permute.xlu0 %1086 }
 0x4a9   : > { %1650 = vmatmul.mubr.msk.bf16.vlgmr.msra.gmra.mxu1 %vm690_vm4, %v748_v36  ;;  %v865_v40 = vpack.c.bf16 %v864_v37, %v864_v37  ;;  %v1092_v48 = vsel %vm757_vm5, %v1087_v46, 0  ;;  %v1569_v36 = vld [vmem:[%s2366_s10] ss:$0 sm:$0xff]  ;;  %v1819_v46 = vld [vmem:[%s2369_s13 + $0x8] sm:$0xff]  }
 0x4aa   : > { %1660 = vmatpush3.bf16.msra.mxu1 %v872_v39  ;;  %1661 = vmatprep.mubr.msk.bf16.mxu1 %vm1955_vm1, %v1954_v8 }
 0x4ab   : > { %1671 = vmatprep.subr.bf16.mxu1 %v1954_v8 }
 0x4ae   : > { %v1836_v41 = vpop.eup %1835 }
 0x4af   : > { %v974_v43 = vmul.f32 %v1836_v41, %v1828_v21  ;;  %v1814_v41 = vld [vmem:[%s2369_s13 + $0x30] sm:$0xff]  }
 0x4b1   : > { %1662 = vmatmul.mubr.msk.bf16.vlgmr.msra.gmra.mxu1 %vm690_vm4, %v865_v40  ;;  %v975_v47 = vpack.c.bf16 %v974_v43, %v974_v43  ;;  %v1813_v40 = vld [vmem:[%s2369_s13 + $0x38] sm:$0xff]   ;;  %v1816_v43 = vld [vmem:[%s2369_s13 + $0x20] sm:$0xff]  }
 0x4b2   : > { %1673 = vmatprep.mubr.msk.bf16.mxu1 %vm1955_vm1, %v1954_v8 }
 0x4cd   : > { %v1082_v42 = vpop.xlane.xlu1 %1081 }
 0x4ce   : > { %1837 = vrcp.f32 %v1082_v42  ;;  %v1815_v42 = vld [vmem:[%s2369_s13 + $0x28] sm:$0xff]  }
 0x4d1   : > { %v977_v44 = vpop.permute.xlu1 %976 }
 0x4d2   : > { %v982_v45 = vsel %vm757_vm5, %v977_v44, 0  ;;  %v1817_v44 = vld [vmem:[%s2369_s13 + $0x18] sm:$0xff]  }
 0x4d3   : > { %1672 = vmatpush3.bf16.msra.mxu1 %v982_v45  ;;  %v1818_v45 = vld [vmem:[%s2369_s13 + $0x10] sm:$0xff]  }
 0x4d4   : > { %1683 = vmatprep.subr.bf16.mxu1 %v1954_v8 }
 0x4d6   : > { %1674 = vmatmul.mubr.msk.bf16.vlgmr.msra.gmra.mxu1 %vm690_vm4, %v975_v47  ;;  %v1820_v47 = vld [vmem:[%s2369_s13] sm:$0xff]  }
 0x4d7   : > { %1684 = vmatpush3.bf16.msra.mxu1 %v1092_v48  ;;  %1685 = vmatprep.mubr.msk.bf16.mxu1 %vm1955_vm1, %v1954_v8  ;;  %v1570_v48 = vld [vmem:[#allocation5] ss:$0 sm:$0xff] }
 0x4d8   : > { %1697 = vmatprep.subr.bf16.mxu1 %v1954_v8 }
 0x4db   : > { %v1838_v49 = vpop.eup %1837 }
 0x4dc   : > { %v1084_v50 = vmul.f32 %v1838_v49, %v1830_v26 }
 0x4de   : > { %v1085_v51 = vpack.c.bf16 %v1084_v50, %v1084_v50 }
 0x4e0   : > { %1686 = vmatmul.mubr.msk.bf16.vlgmr.msra.gmra.mxu1 %vm690_vm4, %v1085_v51 }
 0x4e1   : > { %1701 = vmatprep.mubr.msk.bf16.mxu1 %vm1955_vm1, %v1954_v8  ;;  %1698 = vmatpush3.bf16.msra.mxu1 %v1811_v29 }
 0x4e2   : > { %1699 = vmatprep.subr.bf16.mxu1 %v1954_v8 }
 0x569   : > { %v795_v52 = vpop.f32.mrf.mxu1 }
 0x56b   : > { %v1651_v53 = vpop.f32.mrf.mxu1 }
 0x56d   : > { %v798_v54 = vpop.f32.mrf.mxu1 }
 0x56f   : > { %v1652_v55 = vpop.f32.mrf.mxu1 }
 0x571   : > { %v908_v56 = vpop.f32.mrf.mxu1 }
 0x572   : > { %1135 = vrot.lane.b32.xlu1 %v908_v56, %s1963_s16 }
 0x573   : > { %v1663_v57 = vpop.f32.mrf.mxu1 }
 0x575   : > { %v911_v58 = vpop.f32.mrf.mxu1 }
 0x577   : > { %v1664_v59 = vpop.f32.mrf.mxu1 }
 0x596   : > { %v1018_v60 = vpop.f32.mrf.mxu1 }
 0x597   : > { %1139 = vrot.lane.b32.xlu0 %v1018_v60, %s1964_s24  ;;  %s510_s24 = sand.u32 1, %s1935_s19  }
 0x598   : > { %v1675_v62 = vpop.f32.mrf.mxu1  ;;  %s1542_s26 = sshll.u32 %s510_s24, 3  ;;  %s1441_s21 = scalar_lea.sflag [#allocation7], %s510_s24 }
 0x599   : > { %s512_s22 = scalar_lea.vmem [#allocation8], %s1542_s26 }
 0x59a   : > { %v1021_v1 = vpop.f32.mrf.mxu1  ;;  %s1455_s20 = sshll.u32 %s512_s22, 4  ;;  %s2311_s20 = int_to_ptr.vmem [resolvable:$true] %s1455_s20 }
 0x59b   : > { %s1871_s26 = scalar_lea.vmem %s2311_s20, 128 }
 0x59c   : > { %v1676_v2 = vpop.f32.mrf.mxu1  ;;  %p1872_p10 = scmp.ne.s32.totalorder %s2311_s20, %s1871_s26 }
 0x59e   : > { %p1873_p11 = pnand %p1872_p10, %p2087_p4 }
 0x5a0   : > { %v1128_v3 = vpop.f32.mrf.mxu1  ;;  %p1874_p13 = pneg %p1873_p11 }
 0x5a1   : > { %1143 = vrot.lane.b32.xlu1 %v1128_v3, %s1965_s27  ;;  %s1875_s27 = sshll.u32 %s1966_s25, 4  ;;  %s1876_s27 = int_to_ptr.vmem [resolvable:$false] %s1875_s27 }
 0x5a2   : > { %v1687_v4 = vpop.f32.mrf.mxu1  ;;  %s1877_s18 = scalar_lea.vmem %s1876_s27, 256  ;;  %p1878_p0 = scmp.lt.s32.totalorder %s2311_s20, %s1876_s27 }
 0x5a3   : > { %p1879_p1 = scmp.lt.s32.totalorder %s1877_s18, %s1871_s26 }
 0x5a4   : > { %v1131_v5 = vpop.f32.mrf.mxu1 }
 0x5a5   : > { %p1880_p2 = por %p1879_p1, %p1878_p0 }
 0x5a6   : > { %v1688_v6 = vpop.f32.mrf.mxu1 }
 0x5a7   : > { %p1881_p3 = pnand %p1880_p2, %p1874_p13 }
 0x5e4   : > { %v1136_v7 = vpop.permute.xlu1 %1135 }
 0x5e5   : > { %v1146_v10 = vsel %vm690_vm4, %v795_v52, %v1136_v7 }
 0x609   : > { %v1140_v9 = vpop.permute.xlu0 %1139 }
 0x60a   : > { %v1148_v11 = vsel %vm1147_vm6, %v1146_v10, %v1140_v9 }
 0x613   : > { %v1144_v12 = vpop.permute.xlu1 %1143 }
 0x614   : > { %v1150_v13 = vsel %vm1149_vm7, %v1148_v11, %v1144_v12 }
 0x615   : > { %v1151_v14 = vpack.c.bf16 %v1150_v13, %v1150_v13 }
 0x617   : > { %1152 = vst.msk [vmem:[#allocation4] sm:$0xf] %vm686_vm3, %v1151_v14 }
 0x61e   : > { %v1153_v15 = vld [vmem:[#allocation4] sm:$0xf] }
 0x61f   : > { %1694 = vmatmul.mubr.msk.bf16.vlgmr.msra.gmra.mxu0 %vm521_vm0, %v1153_v15 }
 0x620   : > { %1721 = vmatprep.mubr.msk.bf16.mxu0 %vm1955_vm1, %v1954_v8  ;;  %1706 = vmatpush3.bf16.msra.mxu0 %v1813_v40 }
 0x621   : > { %1707 = vmatprep.subr.bf16.mxu0 %v1954_v8 }
 0x624   : > { %1708 = vmatpush3.bf16.msra.mxu0 %v1814_v41 }
 0x625   : > { %1709 = vmatprep.subr.bf16.mxu0 %v1954_v8 }
 0x628   : > { %1710 = vmatpush3.bf16.msra.mxu0 %v1815_v42 }
 0x629   : > { %1711 = vmatprep.subr.bf16.mxu0 %v1954_v8 }
 0x62c   : > { %1712 = vmatpush3.bf16.msra.mxu0 %v1816_v43 }
 0x62d   : > { %1713 = vmatprep.subr.bf16.mxu0 %v1954_v8 }
 0x630   : > { %1714 = vmatpush3.bf16.msra.mxu0 %v1817_v44 }
 0x631   : > { %1715 = vmatprep.subr.bf16.mxu0 %v1954_v8 }
 0x634   : > { %1716 = vmatpush3.bf16.msra.mxu0 %v1818_v45 }
 0x635   : > { %1717 = vmatprep.subr.bf16.mxu0 %v1954_v8 }
 0x638   : > { %1718 = vmatpush3.bf16.msra.mxu0 %v1819_v46 }
 0x639   : > { %1719 = vmatprep.subr.bf16.mxu0 %v1954_v8 }
 0x63c   : > { %1720 = vmatpush3.bf16.msra.mxu0 %v1820_v47 }
 0x6df   : > { %v1214_v17 = vpop.f32.mrf.mxu0 }
 0x6e0   : > { %v1215_v18 = vadd.f32 %v1564_v16, %v1214_v17 }
 0x6e1   : > { %v1695_v19 = vpop.f32.mrf.mxu0 }
 0x6e2   : > { %v2249_v20 = vadd.f32 %v1215_v18, %v2128_v0  ;;  %v1812_v0 = vld [vmem:[%s2367_s11] sm:$0xff]  }
 0x6e3   : > { %v1217_v21 = vpop.f32.mrf.mxu0  ;;  %1700 = vmatpush3.bf16.msra.mxu1 %v1812_v0 }
 0x6e4   : > { %v1221_v22 = vsel %vm521_vm0, %v2249_v20, 0.0 }
 0x6e5   : > { %1222 = vadd.xlane.f32.xlu0 %v1221_v22  ;;  %v1696_v23 = vpop.f32.mrf.mxu0 }
 0x76e   : > { %v1223_v24 = vpop.xlane.xlu0 %1222 }
 0x76f   : > { %v1224_v25 = vmul.f32 0.03125, %v1223_v24 }
 0x771   : > { %v1225_v26 = vsub.f32 %v2249_v20, %v1224_v25 }
 0x773   : > { %v1226_v27 = vmul.f32 %v1225_v26, %v1225_v26 }
 0x775   : > { %v1227_v28 = vsel %vm521_vm0, %v1226_v27, 0.0 }
 0x776   : > { %1228 = vadd.xlane.f32.xlu1 %v1227_v28 }
 0x7ff   : > { %v1229_v30 = vpop.xlane.xlu1 %1228 }
 0x800   : > { %v1230_v31 = vmul.f32 0.03125, %v1229_v30 }
 0x802   : > { %v1231_v32 = vadd.f32 1e-05, %v1230_v31 }
 0x804   : > { %1839 = vrsqrt.f32 %v1231_v32 }
 0x811   : > { %v1840_v33 = vpop.eup %1839 }
 0x812   : > { %v1233_v35 = vmul.f32 %v1840_v33, %v1225_v26 }
 0x814   : > { %v1241_v38 = vmul.f32 %v1568_v34, %v1233_v35 }
 0x816   : > { %v1249_v39 = vadd.f32 %v1569_v36, %v1241_v38 }
 0x818   : > { %v1250_v37 = vpack.c.bf16 %v1249_v39, %v1249_v39 }
 0x81a   : > { %1702 = vmatmul.mubr.msk.bf16.vlgmr.msra.gmra.mxu1 %vm521_vm0, %v1250_v37 }
 0x8da   : > { %v1311_v49 = vpop.f32.mrf.mxu1 }
 0x8db   : > { %v1312_v50 = vadd.f32 %v1570_v48, %v1311_v49 }
 0x8dc   : > { %v1703_v51 = vpop.f32.mrf.mxu1 }
 0x8dd   : > { %v1317_v52 = vpack.c.bf16 %v1312_v50, %v1312_v50 }
 0x8de   : > { %v1314_v53 = vpop.f32.mrf.mxu1 }
 0x8df   : > { %v1574_v54 = vmul.bf16 3218784218, %v1317_v52 }
 0x8e0   : > { %v1704_v55 = vpop.f32.mrf.mxu1 }
 0x8e1   : > { %v1321_v56 = vmul.bf16 1069105081, %v1574_v54 }
 0x8e3   : > { %1841 = vpow.bf16 %v1321_v56 }
 0x8f1   : > { %v1842_v57 = vpop.eup %1841 }
 0x8f2   : > { %v1323_v58 = vadd.bf16 1065369472, %v1842_v57 }
 0x8f4   : > { %1843 = vrcp.bf16 %v1323_v58 }
 0x902   : > { %v1844_v8 = vpop.eup %1843 }
 0x903   : > { %v1325_v59 = vmul.bf16 1065369472, %v1844_v8 }
 0x905   : > { %v1326_v60 = vmul.bf16 %v1325_v59, %v1317_v52 }
 0x907   : > { %1722 = vmatmul.mubr.bf16.vlgmr.msra.gmra.mxu0 %v1326_v60 }
 0x9c7   : > { %v1432_v62 = vpop.f32.mrf.mxu0 }
 0x9c8   : > { %v1433_v63 = vadd.f32 %v1575_v61, %v1432_v62 }
 0x9c9   : > { %v1723_v1 = vpop.f32.mrf.mxu0 }
 0x9ca   : > { %v1438_v2 = vadd.f32 %v1433_v63, %v2249_v20 }
 0x9cb   : > { %v1435_v3 = vpop.f32.mrf.mxu0 }
 0x9cc   : > { %1439 = vst.msk [vmem:[%s512_s22] sm:$0xff] %vm521_vm0, %v1438_v2 }
 0x9cd   : > { %v1724_v4 = vpop.f32.mrf.mxu0 }
 0x9ce   : > { %1884 = shalt.err (!%p1881_p3)
}
 0x9cf   : > { %s1885_s22 = scalar_lea.hbm %s2309_s29, 128  ;;  %s1889_s17 = scalar_lea.hbm %s2371_s15, 256 }
 0x9d0   : > { %p1886_p5 = scmp.ne.s32.totalorder %s2309_s29, %s1885_s22  ;;  %p1890_p9 = scmp.lt.s32.totalorder %s2309_s29, %s2371_s15 }
 0x9d1   : > { %p1891_p12 = scmp.lt.s32.totalorder %s1889_s17, %s1885_s22 }
 0x9d2   : > { %p1887_p6 = pnand %p1886_p5, %p2087_p4 }
 0x9d3   : > { %p1892_p10 = por %p1891_p12, %p1890_p9 }
 0x9d4   : > { %p1888_p7 = pneg %p1887_p6 }
 0x9d6   : > { %p1893_p11 = pnand %p1892_p10, %p1888_p7 }
 0x9d8   : > { %1896 = shalt.err (!%p1893_p11)
}
 0x9d9   : > { %1729 = dma.vmem_to_hbm [thread:$0]  (%p2087_p4), %s2311_s20, 128, %s2309_s29, %s1441_s21  }
 0x9da PF: > { %s2387_s26 = sld [smem:[#allocation11_spill]]  ;;  %p1741_p13 = scmp.ge.s32.totalorder %s1951_s23, 2 }
 0x9dc   : > { %p1736_p0 = pnand %p1741_p13, %p2094_p8 }
 0x9de   : > { %p1737_p1 = pneg %p1736_p0 }
 0x9e0   : > { %s1467_s27 = sand.u32 1, %s2387_s26  }
 0x9e1   : > { %s1468_s0 = scalar_lea.sflag [#allocation7], %s1467_s27 }
 0x9e2   : > { %1926 = dma.done.wait (%p1737_p1), %s1468_s0, 128  }
 0x9e3   : > { %1928 = vsyncadd (%p1737_p1), %s1468_s0, 4294967168  ;;  %s29_s23 = sadd.s32 1, %s1951_s23   ;;  %s2388_s28 = sld [smem:[#allocation12_spill]] }
 0x9e4   : > { %p26_p2 = scmp.ge.s32.totalorder %s29_s23, 4   ;;  %s2389_s20 = sld [smem:[#allocation15_spill]] }
 0x9e5   : > { %s2390_s21 = sld [smem:[#allocation13_spill]]  ;;  %s2392_s18 = smov %s1935_s19 }
 0x9e6   : > { %s2391_s22 = sld [smem:[#allocation14_spill]]  ;;  %28 = sbr.rel (!%p26_p2) target bundleno = 7 (0x7), region = 120 }
 0x9e9   : > { %s2393_s19 = smov %s2388_s28 }
 0x9eb   :  { %1473 = vsyncpa [#allocation6], 1 }
 0x9ec   :  { %1475 = vsyncpa [#allocation6 + $0x1], 1 }
 0x9ed   :  { %1476 = vsyncpa [#allocation7], 1 }
 0x9ee   :  { %1478 = vsyncpa [#allocation7 + $0x1], 1 }

</bundles_post_ra>
